<compile_context>
chip_gen: v5e
topology: v5e:2x2
jax: 0.10.0
libtpu: 0.0.40
codegen_flags: <defaults>
</compile_context>

<pallas_src>
import math

import jax
import jax.numpy as jnp
from jax.experimental import pallas as pl
from jax.experimental.pallas import tpu as pltpu


# ----------------------------- in-kernel helpers -----------------------------

def _layernorm(x, gamma, beta, eps=1e-5):
    mu = jnp.mean(x, axis=-1, keepdims=True)
    xc = x - mu
    var = jnp.mean(xc * xc, axis=-1, keepdims=True)
    return xc * jax.lax.rsqrt(var + eps) * gamma + beta


def _gelu_tanh(x):
    # tanh-approximate GELU; tanh runs on the EUP slot (VALU stays free).
    # Max abs deviation from exact (erf) GELU ~3e-3, far below test tolerance.
    c = math.sqrt(2.0 / math.pi)
    return 0.5 * x * (1.0 + jnp.tanh(c * (x + 0.044715 * (x * x * x))))


# --------------------------------- the kernel --------------------------------

def _make_kernel(n_visual, n_obj, n_heads, d_head, ff_inner, group):
    n_total = n_visual + n_obj
    gnt = group * n_total
    gnv = group * n_visual
    scale = 1.0 / math.sqrt(d_head)

    def kernel(x_ref, objs_ref, bias_ref,
               wlin_ref, blin_ref,
               g1_ref, b1_ref,
               wq_ref, wk_ref, wv_ref, wo_ref, bo_ref,
               g2_ref, b2_ref,
               wp_ref, bp_ref, w2_ref, bf2_ref,
               gates_ref,
               o_ref):
        f32 = jnp.float32
        bf16 = jnp.bfloat16

        x = x_ref[...]          # (G, NV, D)  f32
        objs = objs_ref[...]    # (G, NO, DC) f32
        dim = x.shape[-1]

        # objs = self.linear(objs)  — bf16 MXU inputs, f32 accumulation.
        objs2 = objs.reshape(group * n_obj, objs.shape[-1]).astype(bf16)
        objs_p = jnp.dot(objs2, wlin_ref[...],
                         preferred_element_type=f32) + blin_ref[...]
        objs_p = objs_p.reshape(group, n_obj, dim)

        # torch.cat([x, objs], dim=1), built in registers (no VMEM scratch).
        cat = jnp.concatenate([x, objs_p], axis=1)          # (G, NT, D)

        # norm1 (f32 elementwise) then QKV projections over all G*NT rows.
        h = _layernorm(cat, g1_ref[...], b1_ref[...]).reshape(gnt, dim)
        hb = h.astype(bf16)
        q = jnp.dot(hb, wq_ref[...], preferred_element_type=f32)
        k = jnp.dot(hb, wk_ref[...], preferred_element_type=f32)
        v = jnp.dot(hb, wv_ref[...], preferred_element_type=f32)

        # Multi-head attention over all grouped rows at once; a block-diagonal
        # additive bias keeps attention within each batch element.  Each head's
        # (P @ V) is pushed straight through its slice of W_o (no concatenate).
        bias = bias_ref[...]                                 # (G*NT, G*NT)
        attn_out = jnp.zeros((gnt, dim), f32) + bo_ref[...]
        for hh in range(n_heads):
            sl = slice(hh * d_head, (hh + 1) * d_head)
            qh = q[:, sl].astype(bf16)
            kh = k[:, sl].astype(bf16)
            vh = v[:, sl].astype(bf16)
            s = jax.lax.dot_general(qh, kh, (((1,), (1,)), ((), ())),
                                    preferred_element_type=f32) * scale + bias
            s = s - jnp.max(s, axis=-1, keepdims=True)
            p = jnp.exp(s)
            p = p * pl.reciprocal(jnp.sum(p, axis=-1, keepdims=True),
                                  approx=True)
            oh = jnp.dot(p.astype(bf16), vh, preferred_element_type=f32)
            attn_out = attn_out + jnp.dot(oh.astype(bf16), wo_ref[sl, :],
                                          preferred_element_type=f32)

        gate_attn = gates_ref[0, 0]    # tanh(alpha_attn),  scale = 1
        gate_dense = gates_ref[0, 1]   # tanh(alpha_dense)

        # x = x + tanh(alpha_attn) * attn(norm1(cat))[:, :N_visual]
        attn_vis = attn_out.reshape(group, n_total, dim)[:, 0:n_visual, :]
        x1 = (x + gate_attn * attn_vis).reshape(gnv, dim)

        # x = x + tanh(alpha_dense) * ff(norm2(x))   (FeedForward with GEGLU)
        h2 = _layernorm(x1, g2_ref[...], b2_ref[...]).astype(bf16)
        proj = jnp.dot(h2, wp_ref[...], preferred_element_type=f32) + bp_ref[...]
        a = proj[:, 0:ff_inner]
        g = proj[:, ff_inner:2 * ff_inner]
        geglu = (a * _gelu_tanh(g)).astype(bf16)
        ff = jnp.dot(geglu, w2_ref[...], preferred_element_type=f32) + bf2_ref[...]

        o_ref[...] = (x1 + gate_dense * ff).reshape(group, n_visual, dim)

    return kernel


# --------------------------------- wrapper ------------------------------------

def _choose_group(batch, n_total, target_rows=128):
    """Largest divisor of batch keeping G*NT <= target_rows (fills MXU rows)."""
    g = 1
    for cand in range(1, batch + 1):
        if batch % cand == 0 and cand * n_total <= max(target_rows, n_total):
            g = cand
    return g


def gated_self_attention_dense(x, objs, params, *, n_heads, d_head):
    B, NV, D = x.shape
    _, NO, DC = objs.shape
    NT = NV + NO
    ff_inner = 4 * D

    G = _choose_group(B, NT)
    GB = B // G
    GNT = G * NT

    # PyTorch Linear stores weights as (out, in); kernel consumes (in, out),
    # pre-cast to bf16 for the MXU (halves weight DMA traffic too).
    def tw(w):
        return jnp.asarray(w, jnp.float32).T.astype(jnp.bfloat16)

    def row(b):
        return jnp.asarray(b, jnp.float32).reshape(1, -1)

    weights = [
        tw(params["w_lin"]), row(params["b_lin"]),
        row(params["g1"]), row(params["be1"]),
        tw(params["wq"]), tw(params["wk"]), tw(params["wv"]),
        tw(params["wo"]), row(params["bo"]),
        row(params["g2"]), row(params["be2"]),
        tw(params["wp"]), row(params["bp"]),
        tw(params["w2"]), row(params["b2"]),
    ]
    # tanh of the scalar gate parameters is trivial scalar glue; host-side.
    gates = jnp.tanh(
        jnp.array([params["alpha_attn"], params["alpha_dense"]], jnp.float32)
    ).reshape(1, 2)

    # Block-diagonal additive bias: rows of different batch elements within a
    # group must not attend to each other.
    seg = jnp.arange(GNT, dtype=jnp.int32) // NT
    bias = jnp.where(seg[:, None] == seg[None, :], 0.0, -1e30).astype(jnp.float32)

    in_specs = (
        [pl.BlockSpec((G, NV, D), lambda b: (b, 0, 0)),
         pl.BlockSpec((G, NO, DC), lambda b: (b, 0, 0)),
         pl.BlockSpec((GNT, GNT), lambda b: (0, 0))]
        + [pl.BlockSpec(w.shape, lambda b: (0, 0)) for w in weights]
        + [pl.BlockSpec((1, 2), lambda b: (0, 0),
                        memory_space=pltpu.MemorySpace.SMEM)]
    )

    # TODO(synk): for production GLIGEN sizes (NV ~ 4096) add flash-style
    # tiling over the visual-token axis so scores/activations fit v7x VMEM.
    kernel = _make_kernel(NV, NO, n_heads, d_head, ff_inner, G)
    return pl.pallas_call(
        kernel,
        out_shape=jax.ShapeDtypeStruct((B, NV, D), jnp.float32),
        grid=(GB,),
        in_specs=in_specs,
        out_specs=pl.BlockSpec((G, NV, D), lambda b: (b, 0, 0)),
        compiler_params=pltpu.CompilerParams(dimension_semantics=("parallel",)),
    )(x, objs, bias, *weights, gates)


# ------------------------------ params & reference ----------------------------

def init_params(key, query_dim, context_dim, n_heads, d_head):
    inner = n_heads * d_head
    ff_inner = 4 * query_dim
    ks = jax.random.split(key, 20)

    def w(k, shape, s=0.1):
        return s * jax.random.normal(k, shape, jnp.float32)

    return dict(
        w_lin=w(ks[0], (query_dim, context_dim)),
        b_lin=w(ks[1], (query_dim,)),
        g1=1.0 + 0.05 * jax.random.normal(ks[2], (query_dim,), jnp.float32),
        be1=w(ks[3], (query_dim,), 0.05),
        wq=w(ks[4], (inner, query_dim)),
        wk=w(ks[5], (inner, query_dim)),
        wv=w(ks[6], (inner, query_dim)),
        wo=w(ks[7], (query_dim, inner)),
        bo=w(ks[8], (query_dim,)),
        g2=1.0 + 0.05 * jax.random.normal(ks[9], (query_dim,), jnp.float32),
        be2=w(ks[10], (query_dim,), 0.05),
        wp=w(ks[11], (2 * ff_inner, query_dim)),
        bp=w(ks[12], (2 * ff_inner,)),
        w2=w(ks[13], (query_dim, ff_inner)),
        b2=w(ks[14], (query_dim,)),
        # The PyTorch module initializes both gates to 0.0 (output == x); use
        # nonzero deterministic values so the attention/FF paths are exercised.
        alpha_attn=0.3,
        alpha_dense=-0.2,
    )


def reference_forward(x, objs, p, *, n_heads, d_head):
    def layernorm(t, g, b, eps=1e-5):
        mu = jnp.mean(t, axis=-1, keepdims=True)
        var = jnp.mean((t - mu) ** 2, axis=-1, keepdims=True)
        return (t - mu) * jax.lax.rsqrt(var + eps) * g + b

    NV = x.shape[1]
    objs_p = objs @ p["w_lin"].T + p["b_lin"]
    cat = jnp.concatenate([x, objs_p], axis=1)
    h = layernorm(cat, p["g1"], p["be1"])
    q = h @ p["wq"].T
    k = h @ p["wk"].T
    v = h @ p["wv"].T
    B, NT, HC = q.shape
    H, C = n_heads, d_head

    def split(t):
        return t.reshape(B, NT, H, C).transpose(0, 2, 1, 3)

    qh, kh, vh = split(q), split(k), split(v)
    s = jnp.einsum("bhnc,bhmc->bhnm", qh, kh) / jnp.sqrt(jnp.float32(C))
    a = jax.nn.softmax(s, axis=-1)
    o = jnp.einsum("bhnm,bhmc->bhnc", a, vh)
    o = o.transpose(0, 2, 1, 3).reshape(B, NT, H * C)
    o = o @ p["wo"].T + p["bo"]
    x1 = x + jnp.tanh(jnp.float32(p["alpha_attn"])) * o[:, :NV]

    h2 = layernorm(x1, p["g2"], p["be2"])
    pr = h2 @ p["wp"].T + p["bp"]
    half = pr.shape[-1] // 2
    a2, g2 = pr[..., :half], pr[..., half:]
    ff = (a2 * jax.nn.gelu(g2, approximate=False)) @ p["w2"].T + p["b2"]
    return x1 + jnp.tanh(jnp.float32(p["alpha_dense"])) * ff


# ----------------------------------- main --------------------------------------

if __name__ == "__main__":
    B, NV, NO = 2, 16, 8
    query_dim, context_dim = 32, 16
    n_heads, d_head = 2, 128  # inner_dim = 256; head slices are 128-lane aligned

    key = jax.random.PRNGKey(0)
    kx, ko, kp = jax.random.split(key, 3)
    x = jax.random.normal(kx, (B, NV, query_dim), jnp.float32)
    objs = jax.random.normal(ko, (B, NO, context_dim), jnp.float32)
    params = init_params(kp, query_dim, context_dim, n_heads, d_head)

    out = gated_self_attention_dense(x, objs, params, n_heads=n_heads, d_head=d_head)
    out = jax.block_until_ready(out)

    ref = reference_forward(x, objs, params, n_heads=n_heads, d_head=d_head)
    err = float(jnp.max(jnp.abs(out - ref)))
    assert out.shape == (B, NV, query_dim), out.shape
    assert err < 5e-2, f"max abs error vs JAX reference: {err}"
    print("KERNEL_OK")
</pallas_src>

<mosaic_0001>
module attributes {stable_mosaic.version = 11 : i64} {
  func.func @kernel(%arg0: i32, %arg1: memref<2x16x32xf32, #tpu.memory_space<vmem>>, %arg2: memref<2x8x16xf32, #tpu.memory_space<vmem>>, %arg3: memref<48x48xf32, #tpu.memory_space<vmem>>, %arg4: memref<16x32xbf16, #tpu.memory_space<vmem>>, %arg5: memref<1x32xf32, #tpu.memory_space<vmem>>, %arg6: memref<1x32xf32, #tpu.memory_space<vmem>>, %arg7: memref<1x32xf32, #tpu.memory_space<vmem>>, %arg8: memref<32x256xbf16, #tpu.memory_space<vmem>>, %arg9: memref<32x256xbf16, #tpu.memory_space<vmem>>, %arg10: memref<32x256xbf16, #tpu.memory_space<vmem>>, %arg11: memref<256x32xbf16, #tpu.memory_space<vmem>>, %arg12: memref<1x32xf32, #tpu.memory_space<vmem>>, %arg13: memref<1x32xf32, #tpu.memory_space<vmem>>, %arg14: memref<1x32xf32, #tpu.memory_space<vmem>>, %arg15: memref<32x256xbf16, #tpu.memory_space<vmem>>, %arg16: memref<1x256xf32, #tpu.memory_space<vmem>>, %arg17: memref<128x32xbf16, #tpu.memory_space<vmem>>, %arg18: memref<1x32xf32, #tpu.memory_space<vmem>>, %arg19: memref<1x2xf32, #tpu.memory_space<smem>>, %arg20: memref<2x16x32xf32, #tpu.memory_space<vmem>>) attributes {dimension_semantics = [#tpu.dimension_semantics<parallel>], iteration_bounds = array<i64: 1>, scalar_prefetch = 0 : i64, scratch_operands = 0 : i64, tpu.core_type = #tpu.core_type<tc>, window_params = [{transform_indices = @transform_0, window_bounds = array<i64: 2, 16, 32>}, {transform_indices = @transform_1, window_bounds = array<i64: 2, 8, 16>}, {pipeline_mode = #tpu.pipeline_mode<synchronous>, transform_indices = @transform_2, window_bounds = array<i64: 48, 48>}, {pipeline_mode = #tpu.pipeline_mode<synchronous>, transform_indices = @transform_3, window_bounds = array<i64: 16, 32>}, {pipeline_mode = #tpu.pipeline_mode<synchronous>, transform_indices = @transform_4, window_bounds = array<i64: 1, 32>}, {pipeline_mode = #tpu.pipeline_mode<synchronous>, transform_indices = @transform_5, window_bounds = array<i64: 1, 32>}, {pipeline_mode = #tpu.pipeline_mode<synchronous>, transform_indices = @transform_6, window_bounds = array<i64: 1, 32>}, {pipeline_mode = #tpu.pipeline_mode<synchronous>, transform_indices = @transform_7, window_bounds = array<i64: 32, 256>}, {pipeline_mode = #tpu.pipeline_mode<synchronous>, transform_indices = @transform_8, window_bounds = array<i64: 32, 256>}, {pipeline_mode = #tpu.pipeline_mode<synchronous>, transform_indices = @transform_9, window_bounds = array<i64: 32, 256>}, {pipeline_mode = #tpu.pipeline_mode<synchronous>, transform_indices = @transform_10, window_bounds = array<i64: 256, 32>}, {pipeline_mode = #tpu.pipeline_mode<synchronous>, transform_indices = @transform_11, window_bounds = array<i64: 1, 32>}, {pipeline_mode = #tpu.pipeline_mode<synchronous>, transform_indices = @transform_12, window_bounds = array<i64: 1, 32>}, {pipeline_mode = #tpu.pipeline_mode<synchronous>, transform_indices = @transform_13, window_bounds = array<i64: 1, 32>}, {pipeline_mode = #tpu.pipeline_mode<synchronous>, transform_indices = @transform_14, window_bounds = array<i64: 32, 256>}, {pipeline_mode = #tpu.pipeline_mode<synchronous>, transform_indices = @transform_15, window_bounds = array<i64: 1, 256>}, {pipeline_mode = #tpu.pipeline_mode<synchronous>, transform_indices = @transform_16, window_bounds = array<i64: 128, 32>}, {pipeline_mode = #tpu.pipeline_mode<synchronous>, transform_indices = @transform_17, window_bounds = array<i64: 1, 32>}, {transform_indices = @transform_18, window_bounds = array<i64: 1, 2>}, {transform_indices = @transform_19, window_bounds = array<i64: 2, 16, 32>}]} {
    %c0 = arith.constant 0 : index
    %c0_0 = arith.constant 0 : index
    %c0_1 = arith.constant 0 : index
    %0 = vector.load %arg1[%c0, %c0_0, %c0_1] : memref<2x16x32xf32, #tpu.memory_space<vmem>>, vector<2x16x32xf32>
    %c0_2 = arith.constant 0 : index
    %c0_3 = arith.constant 0 : index
    %c0_4 = arith.constant 0 : index
    %1 = vector.load %arg2[%c0_2, %c0_3, %c0_4] : memref<2x8x16xf32, #tpu.memory_space<vmem>>, vector<2x8x16xf32>
    %2 = vector.shape_cast %1 : vector<2x8x16xf32> to vector<16x16xf32>
    %3 = arith.truncf %2 : vector<16x16xf32> to vector<16x16xbf16>
    %c0_5 = arith.constant 0 : index
    %c0_6 = arith.constant 0 : index
    %4 = vector.load %arg4[%c0_5, %c0_6] : memref<16x32xbf16, #tpu.memory_space<vmem>>, vector<16x32xbf16>
    %cst = arith.constant dense<0.000000e+00> : vector<16x32xf32>
    %5 = tpu.matmul %3, %4, %cst {dimension_numbers = #tpu.dot_dimension_numbers<[1], [0], [0], [1], [0, 0, 1, 1], [], []>} : vector<16x16xbf16>, vector<16x32xbf16>, vector<16x32xf32> -> vector<16x32xf32>
    %c0_7 = arith.constant 0 : index
    %c0_8 = arith.constant 0 : index
    %6 = vector.load %arg5[%c0_7, %c0_8] : memref<1x32xf32, #tpu.memory_space<vmem>>, vector<1x32xf32>
    %7 = vector.broadcast %6 : vector<1x32xf32> to vector<16x32xf32>
    %8 = arith.addf %5, %7 : vector<16x32xf32>
    %9 = vector.shape_cast %8 : vector<16x32xf32> to vector<2x8x32xf32>
    %10 = tpu.concatenate %0, %9 in 1 : vector<2x16x32xf32>, vector<2x8x32xf32> -> vector<2x24x32xf32>
    %c0_9 = arith.constant 0 : index
    %c0_10 = arith.constant 0 : index
    %11 = vector.load %arg6[%c0_9, %c0_10] : memref<1x32xf32, #tpu.memory_space<vmem>>, vector<1x32xf32>
    %c0_11 = arith.constant 0 : index
    %c0_12 = arith.constant 0 : index
    %12 = vector.load %arg7[%c0_11, %c0_12] : memref<1x32xf32, #tpu.memory_space<vmem>>, vector<1x32xf32>
    %cst_13 = arith.constant dense<0.000000e+00> : vector<2x24xf32>
    %13 = vector.multi_reduction <add>, %10, %cst_13 [2] : vector<2x24x32xf32> to vector<2x24xf32>
    %14 = vector.shape_cast %13 : vector<2x24xf32> to vector<2x24x1xf32>
    %cst_14 = arith.constant 3.200000e+01 : f32
    %15 = vector.broadcast %cst_14 : f32 to vector<2x24x1xf32>
    %16 = arith.divf %14, %15 : vector<2x24x1xf32>
    %17 = vector.broadcast %16 : vector<2x24x1xf32> to vector<2x24x32xf32>
    %18 = arith.subf %10, %17 : vector<2x24x32xf32>
    %19 = arith.mulf %18, %18 : vector<2x24x32xf32>
    %cst_15 = arith.constant dense<0.000000e+00> : vector<2x24xf32>
    %20 = vector.multi_reduction <add>, %19, %cst_15 [2] : vector<2x24x32xf32> to vector<2x24xf32>
    %21 = vector.shape_cast %20 : vector<2x24xf32> to vector<2x24x1xf32>
    %cst_16 = arith.constant 3.200000e+01 : f32
    %22 = vector.broadcast %cst_16 : f32 to vector<2x24x1xf32>
    %23 = arith.divf %21, %22 : vector<2x24x1xf32>
    %cst_17 = arith.constant 9.99999974E-6 : f32
    %24 = vector.broadcast %cst_17 : f32 to vector<2x24x1xf32>
    %25 = arith.addf %23, %24 : vector<2x24x1xf32>
    %26 = math.rsqrt %25 : vector<2x24x1xf32>
    %27 = vector.broadcast %26 : vector<2x24x1xf32> to vector<2x24x32xf32>
    %28 = arith.mulf %18, %27 : vector<2x24x32xf32>
    %29 = vector.shape_cast %11 : vector<1x32xf32> to vector<1x1x32xf32>
    %30 = vector.broadcast %29 : vector<1x1x32xf32> to vector<2x24x32xf32>
    %31 = arith.mulf %28, %30 : vector<2x24x32xf32>
    %32 = vector.shape_cast %12 : vector<1x32xf32> to vector<1x1x32xf32>
    %33 = vector.broadcast %32 : vector<1x1x32xf32> to vector<2x24x32xf32>
    %34 = arith.addf %31, %33 : vector<2x24x32xf32>
    %35 = vector.shape_cast %34 : vector<2x24x32xf32> to vector<48x32xf32>
    %36 = arith.truncf %35 : vector<48x32xf32> to vector<48x32xbf16>
    %c0_18 = arith.constant 0 : index
    %c0_19 = arith.constant 0 : index
    %37 = vector.load %arg8[%c0_18, %c0_19] : memref<32x256xbf16, #tpu.memory_space<vmem>>, vector<32x256xbf16>
    %cst_20 = arith.constant dense<0.000000e+00> : vector<48x256xf32>
    %38 = tpu.matmul %36, %37, %cst_20 {dimension_numbers = #tpu.dot_dimension_numbers<[1], [0], [0], [1], [0, 0, 1, 1], [], []>} : vector<48x32xbf16>, vector<32x256xbf16>, vector<48x256xf32> -> vector<48x256xf32>
    %c0_21 = arith.constant 0 : index
    %c0_22 = arith.constant 0 : index
    %39 = vector.load %arg9[%c0_21, %c0_22] : memref<32x256xbf16, #tpu.memory_space<vmem>>, vector<32x256xbf16>
    %cst_23 = arith.constant dense<0.000000e+00> : vector<48x256xf32>
    %40 = tpu.matmul %36, %39, %cst_23 {dimension_numbers = #tpu.dot_dimension_numbers<[1], [0], [0], [1], [0, 0, 1, 1], [], []>} : vector<48x32xbf16>, vector<32x256xbf16>, vector<48x256xf32> -> vector<48x256xf32>
    %c0_24 = arith.constant 0 : index
    %c0_25 = arith.constant 0 : index
    %41 = vector.load %arg10[%c0_24, %c0_25] : memref<32x256xbf16, #tpu.memory_space<vmem>>, vector<32x256xbf16>
    %cst_26 = arith.constant dense<0.000000e+00> : vector<48x256xf32>
    %42 = tpu.matmul %36, %41, %cst_26 {dimension_numbers = #tpu.dot_dimension_numbers<[1], [0], [0], [1], [0, 0, 1, 1], [], []>} : vector<48x32xbf16>, vector<32x256xbf16>, vector<48x256xf32> -> vector<48x256xf32>
    %c0_27 = arith.constant 0 : index
    %c0_28 = arith.constant 0 : index
    %43 = vector.load %arg3[%c0_27, %c0_28] : memref<48x48xf32, #tpu.memory_space<vmem>>, vector<48x48xf32>
    %cst_29 = arith.constant 0.000000e+00 : f32
    %44 = vector.broadcast %cst_29 : f32 to vector<48x32xf32>
    %c0_30 = arith.constant 0 : index
    %c0_31 = arith.constant 0 : index
    %45 = vector.load %arg12[%c0_30, %c0_31] : memref<1x32xf32, #tpu.memory_space<vmem>>, vector<1x32xf32>
    %46 = vector.broadcast %45 : vector<1x32xf32> to vector<48x32xf32>
    %47 = arith.addf %44, %46 : vector<48x32xf32>
    %48 = vector.extract_strided_slice %38 {offsets = [0, 0], sizes = [48, 128], strides = [1, 1]} : vector<48x256xf32> to vector<48x128xf32>
    %49 = arith.truncf %48 : vector<48x128xf32> to vector<48x128xbf16>
    %50 = vector.extract_strided_slice %40 {offsets = [0, 0], sizes = [48, 128], strides = [1, 1]} : vector<48x256xf32> to vector<48x128xf32>
    %51 = arith.truncf %50 : vector<48x128xf32> to vector<48x128xbf16>
    %52 = vector.extract_strided_slice %42 {offsets = [0, 0], sizes = [48, 128], strides = [1, 1]} : vector<48x256xf32> to vector<48x128xf32>
    %53 = arith.truncf %52 : vector<48x128xf32> to vector<48x128xbf16>
    %cst_32 = arith.constant dense<0.000000e+00> : vector<48x48xf32>
    %54 = tpu.matmul %49, %51, %cst_32 {dimension_numbers = #tpu.dot_dimension_numbers<[1], [1], [0], [0], [0, 0, 1, 0], [], []>} : vector<48x128xbf16>, vector<48x128xbf16>, vector<48x48xf32> -> vector<48x48xf32>
    %cst_33 = arith.constant 0.0883883461 : f32
    %55 = vector.broadcast %cst_33 : f32 to vector<48x48xf32>
    %56 = arith.mulf %54, %55 : vector<48x48xf32>
    %57 = arith.addf %56, %43 : vector<48x48xf32>
    %cst_34 = arith.constant dense<0xFF800000> : vector<48xf32>
    %58 = vector.multi_reduction <maximumf>, %57, %cst_34 [1] : vector<48x48xf32> to vector<48xf32>
    %59 = vector.shape_cast %58 : vector<48xf32> to vector<48x1xf32>
    %60 = vector.broadcast %59 : vector<48x1xf32> to vector<48x48xf32>
    %61 = arith.subf %57, %60 : vector<48x48xf32>
    %62 = math.exp %61 : vector<48x48xf32>
    %cst_35 = arith.constant dense<0.000000e+00> : vector<48xf32>
    %63 = vector.multi_reduction <add>, %62, %cst_35 [1] : vector<48x48xf32> to vector<48xf32>
    %64 = vector.shape_cast %63 : vector<48xf32> to vector<48x1xf32>
    %65 = tpu.reciprocal %64 {approx = true} : vector<48x1xf32> -> vector<48x1xf32>
    %66 = vector.broadcast %65 : vector<48x1xf32> to vector<48x48xf32>
    %67 = arith.mulf %62, %66 : vector<48x48xf32>
    %68 = arith.truncf %67 : vector<48x48xf32> to vector<48x48xbf16>
    %cst_36 = arith.constant dense<0.000000e+00> : vector<48x128xf32>
    %69 = tpu.matmul %68, %53, %cst_36 {dimension_numbers = #tpu.dot_dimension_numbers<[1], [0], [0], [1], [0, 0, 1, 1], [], []>} : vector<48x48xbf16>, vector<48x128xbf16>, vector<48x128xf32> -> vector<48x128xf32>
    %70 = arith.truncf %69 : vector<48x128xf32> to vector<48x128xbf16>
    %c0_37 = arith.constant 0 : index
    %c0_38 = arith.constant 0 : index
    %71 = vector.load %arg11[%c0_37, %c0_38] : memref<256x32xbf16, #tpu.memory_space<vmem>>, vector<128x32xbf16>
    %cst_39 = arith.constant dense<0.000000e+00> : vector<48x32xf32>
    %72 = tpu.matmul %70, %71, %cst_39 {dimension_numbers = #tpu.dot_dimension_numbers<[1], [0], [0], [1], [0, 0, 1, 1], [], []>} : vector<48x128xbf16>, vector<128x32xbf16>, vector<48x32xf32> -> vector<48x32xf32>
    %73 = arith.addf %47, %72 : vector<48x32xf32>
    %74 = vector.extract_strided_slice %38 {offsets = [0, 128], sizes = [48, 128], strides = [1, 1]} : vector<48x256xf32> to vector<48x128xf32>
    %75 = arith.truncf %74 : vector<48x128xf32> to vector<48x128xbf16>
    %76 = vector.extract_strided_slice %40 {offsets = [0, 128], sizes = [48, 128], strides = [1, 1]} : vector<48x256xf32> to vector<48x128xf32>
    %77 = arith.truncf %76 : vector<48x128xf32> to vector<48x128xbf16>
    %78 = vector.extract_strided_slice %42 {offsets = [0, 128], sizes = [48, 128], strides = [1, 1]} : vector<48x256xf32> to vector<48x128xf32>
    %79 = arith.truncf %78 : vector<48x128xf32> to vector<48x128xbf16>
    %cst_40 = arith.constant dense<0.000000e+00> : vector<48x48xf32>
    %80 = tpu.matmul %75, %77, %cst_40 {dimension_numbers = #tpu.dot_dimension_numbers<[1], [1], [0], [0], [0, 0, 1, 0], [], []>} : vector<48x128xbf16>, vector<48x128xbf16>, vector<48x48xf32> -> vector<48x48xf32>
    %cst_41 = arith.constant 0.0883883461 : f32
    %81 = vector.broadcast %cst_41 : f32 to vector<48x48xf32>
    %82 = arith.mulf %80, %81 : vector<48x48xf32>
    %83 = arith.addf %82, %43 : vector<48x48xf32>
    %cst_42 = arith.constant dense<0xFF800000> : vector<48xf32>
    %84 = vector.multi_reduction <maximumf>, %83, %cst_42 [1] : vector<48x48xf32> to vector<48xf32>
    %85 = vector.shape_cast %84 : vector<48xf32> to vector<48x1xf32>
    %86 = vector.broadcast %85 : vector<48x1xf32> to vector<48x48xf32>
    %87 = arith.subf %83, %86 : vector<48x48xf32>
    %88 = math.exp %87 : vector<48x48xf32>
    %cst_43 = arith.constant dense<0.000000e+00> : vector<48xf32>
    %89 = vector.multi_reduction <add>, %88, %cst_43 [1] : vector<48x48xf32> to vector<48xf32>
    %90 = vector.shape_cast %89 : vector<48xf32> to vector<48x1xf32>
    %91 = tpu.reciprocal %90 {approx = true} : vector<48x1xf32> -> vector<48x1xf32>
    %92 = vector.broadcast %91 : vector<48x1xf32> to vector<48x48xf32>
    %93 = arith.mulf %88, %92 : vector<48x48xf32>
    %94 = arith.truncf %93 : vector<48x48xf32> to vector<48x48xbf16>
    %cst_44 = arith.constant dense<0.000000e+00> : vector<48x128xf32>
    %95 = tpu.matmul %94, %79, %cst_44 {dimension_numbers = #tpu.dot_dimension_numbers<[1], [0], [0], [1], [0, 0, 1, 1], [], []>} : vector<48x48xbf16>, vector<48x128xbf16>, vector<48x128xf32> -> vector<48x128xf32>
    %96 = arith.truncf %95 : vector<48x128xf32> to vector<48x128xbf16>
    %c128 = arith.constant 128 : index
    %c0_45 = arith.constant 0 : index
    %97 = vector.load %arg11[%c128, %c0_45] : memref<256x32xbf16, #tpu.memory_space<vmem>>, vector<128x32xbf16>
    %cst_46 = arith.constant dense<0.000000e+00> : vector<48x32xf32>
    %98 = tpu.matmul %96, %97, %cst_46 {dimension_numbers = #tpu.dot_dimension_numbers<[1], [0], [0], [1], [0, 0, 1, 1], [], []>} : vector<48x128xbf16>, vector<128x32xbf16>, vector<48x32xf32> -> vector<48x32xf32>
    %99 = arith.addf %73, %98 : vector<48x32xf32>
    %c0_47 = arith.constant 0 : index
    %c0_48 = arith.constant 0 : index
    %100 = memref.load %arg19[%c0_47, %c0_48] : memref<1x2xf32, #tpu.memory_space<smem>>
    %c0_49 = arith.constant 0 : index
    %c1 = arith.constant 1 : index
    %101 = memref.load %arg19[%c0_49, %c1] : memref<1x2xf32, #tpu.memory_space<smem>>
    %102 = vector.shape_cast %99 : vector<48x32xf32> to vector<2x24x32xf32>
    %103 = vector.extract_strided_slice %102 {offsets = [0, 0, 0], sizes = [2, 16, 32], strides = [1, 1, 1]} : vector<2x24x32xf32> to vector<2x16x32xf32>
    %104 = vector.broadcast %100 : f32 to vector<2x16x32xf32>
    %105 = arith.mulf %104, %103 : vector<2x16x32xf32>
    %106 = arith.addf %0, %105 : vector<2x16x32xf32>
    %107 = vector.shape_cast %106 : vector<2x16x32xf32> to vector<32x32xf32>
    %c0_50 = arith.constant 0 : index
    %c0_51 = arith.constant 0 : index
    %108 = vector.load %arg13[%c0_50, %c0_51] : memref<1x32xf32, #tpu.memory_space<vmem>>, vector<1x32xf32>
    %c0_52 = arith.constant 0 : index
    %c0_53 = arith.constant 0 : index
    %109 = vector.load %arg14[%c0_52, %c0_53] : memref<1x32xf32, #tpu.memory_space<vmem>>, vector<1x32xf32>
    %cst_54 = arith.constant dense<0.000000e+00> : vector<32xf32>
    %110 = vector.multi_reduction <add>, %107, %cst_54 [1] : vector<32x32xf32> to vector<32xf32>
    %111 = vector.shape_cast %110 : vector<32xf32> to vector<32x1xf32>
    %cst_55 = arith.constant 3.200000e+01 : f32
    %112 = vector.broadcast %cst_55 : f32 to vector<32x1xf32>
    %113 = arith.divf %111, %112 : vector<32x1xf32>
    %114 = vector.broadcast %113 : vector<32x1xf32> to vector<32x32xf32>
    %115 = arith.subf %107, %114 : vector<32x32xf32>
    %116 = arith.mulf %115, %115 : vector<32x32xf32>
    %cst_56 = arith.constant dense<0.000000e+00> : vector<32xf32>
    %117 = vector.multi_reduction <add>, %116, %cst_56 [1] : vector<32x32xf32> to vector<32xf32>
    %118 = vector.shape_cast %117 : vector<32xf32> to vector<32x1xf32>
    %cst_57 = arith.constant 3.200000e+01 : f32
    %119 = vector.broadcast %cst_57 : f32 to vector<32x1xf32>
    %120 = arith.divf %118, %119 : vector<32x1xf32>
    %cst_58 = arith.constant 9.99999974E-6 : f32
    %121 = vector.broadcast %cst_58 : f32 to vector<32x1xf32>
    %122 = arith.addf %120, %121 : vector<32x1xf32>
    %123 = math.rsqrt %122 : vector<32x1xf32>
    %124 = vector.broadcast %123 : vector<32x1xf32> to vector<32x32xf32>
    %125 = arith.mulf %115, %124 : vector<32x32xf32>
    %126 = vector.broadcast %108 : vector<1x32xf32> to vector<32x32xf32>
    %127 = arith.mulf %125, %126 : vector<32x32xf32>
    %128 = vector.broadcast %109 : vector<1x32xf32> to vector<32x32xf32>
    %129 = arith.addf %127, %128 : vector<32x32xf32>
    %130 = arith.truncf %129 : vector<32x32xf32> to vector<32x32xbf16>
    %c0_59 = arith.constant 0 : index
    %c0_60 = arith.constant 0 : index
    %131 = vector.load %arg15[%c0_59, %c0_60] : memref<32x256xbf16, #tpu.memory_space<vmem>>, vector<32x256xbf16>
    %cst_61 = arith.constant dense<0.000000e+00> : vector<32x256xf32>
    %132 = tpu.matmul %130, %131, %cst_61 {dimension_numbers = #tpu.dot_dimension_numbers<[1], [0], [0], [1], [0, 0, 1, 1], [], []>} : vector<32x32xbf16>, vector<32x256xbf16>, vector<32x256xf32> -> vector<32x256xf32>
    %c0_62 = arith.constant 0 : index
    %c0_63 = arith.constant 0 : index
    %133 = vector.load %arg16[%c0_62, %c0_63] : memref<1x256xf32, #tpu.memory_space<vmem>>, vector<1x256xf32>
    %134 = vector.broadcast %133 : vector<1x256xf32> to vector<32x256xf32>
    %135 = arith.addf %132, %134 : vector<32x256xf32>
    %136 = vector.extract_strided_slice %135 {offsets = [0, 0], sizes = [32, 128], strides = [1, 1]} : vector<32x256xf32> to vector<32x128xf32>
    %137 = vector.extract_strided_slice %135 {offsets = [0, 128], sizes = [32, 128], strides = [1, 1]} : vector<32x256xf32> to vector<32x128xf32>
    %cst_64 = arith.constant 5.000000e-01 : f32
    %138 = vector.broadcast %cst_64 : f32 to vector<32x128xf32>
    %139 = arith.mulf %138, %137 : vector<32x128xf32>
    %140 = arith.mulf %137, %137 : vector<32x128xf32>
    %141 = arith.mulf %140, %137 : vector<32x128xf32>
    %cst_65 = arith.constant 4.471500e-02 : f32
    %142 = vector.broadcast %cst_65 : f32 to vector<32x128xf32>
    %143 = arith.mulf %142, %141 : vector<32x128xf32>
    %144 = arith.addf %137, %143 : vector<32x128xf32>
    %cst_66 = arith.constant 0.797884583 : f32
    %145 = vector.broadcast %cst_66 : f32 to vector<32x128xf32>
    %146 = arith.mulf %145, %144 : vector<32x128xf32>
    %147 = math.tanh %146 : vector<32x128xf32>
    %cst_67 = arith.constant 1.000000e+00 : f32
    %148 = vector.broadcast %cst_67 : f32 to vector<32x128xf32>
    %149 = arith.addf %148, %147 : vector<32x128xf32>
    %150 = arith.mulf %139, %149 : vector<32x128xf32>
    %151 = arith.mulf %136, %150 : vector<32x128xf32>
    %152 = arith.truncf %151 : vector<32x128xf32> to vector<32x128xbf16>
    %c0_68 = arith.constant 0 : index
    %c0_69 = arith.constant 0 : index
    %153 = vector.load %arg17[%c0_68, %c0_69] : memref<128x32xbf16, #tpu.memory_space<vmem>>, vector<128x32xbf16>
    %cst_70 = arith.constant dense<0.000000e+00> : vector<32x32xf32>
    %154 = tpu.matmul %152, %153, %cst_70 {dimension_numbers = #tpu.dot_dimension_numbers<[1], [0], [0], [1], [0, 0, 1, 1], [], []>} : vector<32x128xbf16>, vector<128x32xbf16>, vector<32x32xf32> -> vector<32x32xf32>
    %c0_71 = arith.constant 0 : index
    %c0_72 = arith.constant 0 : index
    %155 = vector.load %arg18[%c0_71, %c0_72] : memref<1x32xf32, #tpu.memory_space<vmem>>, vector<1x32xf32>
    %156 = vector.broadcast %155 : vector<1x32xf32> to vector<32x32xf32>
    %157 = arith.addf %154, %156 : vector<32x32xf32>
    %158 = vector.broadcast %101 : f32 to vector<32x32xf32>
    %159 = arith.mulf %158, %157 : vector<32x32xf32>
    %160 = arith.addf %107, %159 : vector<32x32xf32>
    %161 = vector.shape_cast %160 : vector<32x32xf32> to vector<2x16x32xf32>
    %c0_73 = arith.constant 0 : index
    %c0_74 = arith.constant 0 : index
    %c0_75 = arith.constant 0 : index
    %162 = vector.load %arg20[%c0_73, %c0_74, %c0_75] : memref<2x16x32xf32, #tpu.memory_space<vmem>>, vector<2x16x32xf32>
    tpu.vector_store %arg20[%c0_73, %c0_74, %c0_75], %161 {strides = array<i32>} : memref<2x16x32xf32, #tpu.memory_space<vmem>>, vector<2x16x32xf32>,
    return
  }
  func.func @transform_0(%arg0: i32) -> (i32, i32, i32) {
    %c0_i32 = arith.constant 0 : i32
    %c0_i32_0 = arith.constant 0 : i32
    %c0_i32_1 = arith.constant 0 : i32
    return %arg0, %c0_i32, %c0_i32_0 : i32, i32, i32
  }
  func.func @transform_1(%arg0: i32) -> (i32, i32, i32) {
    %c0_i32 = arith.constant 0 : i32
    %c0_i32_0 = arith.constant 0 : i32
    %c0_i32_1 = arith.constant 0 : i32
    return %arg0, %c0_i32, %c0_i32_0 : i32, i32, i32
  }
  func.func @transform_2(%arg0: i32) -> (i32, i32) {
    %c0_i32 = arith.constant 0 : i32
    %c0_i32_0 = arith.constant 0 : i32
    %c0_i32_1 = arith.constant 0 : i32
    return %c0_i32, %c0_i32_0 : i32, i32
  }
  func.func @transform_3(%arg0: i32) -> (i32, i32) {
    %c0_i32 = arith.constant 0 : i32
    %c0_i32_0 = arith.constant 0 : i32
    %c0_i32_1 = arith.constant 0 : i32
    return %c0_i32, %c0_i32_0 : i32, i32
  }
  func.func @transform_4(%arg0: i32) -> (i32, i32) {
    %c0_i32 = arith.constant 0 : i32
    %c0_i32_0 = arith.constant 0 : i32
    %c0_i32_1 = arith.constant 0 : i32
    return %c0_i32, %c0_i32_0 : i32, i32
  }
  func.func @transform_5(%arg0: i32) -> (i32, i32) {
    %c0_i32 = arith.constant 0 : i32
    %c0_i32_0 = arith.constant 0 : i32
    %c0_i32_1 = arith.constant 0 : i32
    return %c0_i32, %c0_i32_0 : i32, i32
  }
  func.func @transform_6(%arg0: i32) -> (i32, i32) {
    %c0_i32 = arith.constant 0 : i32
    %c0_i32_0 = arith.constant 0 : i32
    %c0_i32_1 = arith.constant 0 : i32
    return %c0_i32, %c0_i32_0 : i32, i32
  }
  func.func @transform_7(%arg0: i32) -> (i32, i32) {
    %c0_i32 = arith.constant 0 : i32
    %c0_i32_0 = arith.constant 0 : i32
    %c0_i32_1 = arith.constant 0 : i32
    return %c0_i32, %c0_i32_0 : i32, i32
  }
  func.func @transform_8(%arg0: i32) -> (i32, i32) {
    %c0_i32 = arith.constant 0 : i32
    %c0_i32_0 = arith.constant 0 : i32
    %c0_i32_1 = arith.constant 0 : i32
    return %c0_i32, %c0_i32_0 : i32, i32
  }
  func.func @transform_9(%arg0: i32) -> (i32, i32) {
    %c0_i32 = arith.constant 0 : i32
    %c0_i32_0 = arith.constant 0 : i32
    %c0_i32_1 = arith.constant 0 : i32
    return %c0_i32, %c0_i32_0 : i32, i32
  }
  func.func @transform_10(%arg0: i32) -> (i32, i32) {
    %c0_i32 = arith.constant 0 : i32
    %c0_i32_0 = arith.constant 0 : i32
    %c0_i32_1 = arith.constant 0 : i32
    return %c0_i32, %c0_i32_0 : i32, i32
  }
  func.func @transform_11(%arg0: i32) -> (i32, i32) {
    %c0_i32 = arith.constant 0 : i32
    %c0_i32_0 = arith.constant 0 : i32
    %c0_i32_1 = arith.constant 0 : i32
    return %c0_i32, %c0_i32_0 : i32, i32
  }
  func.func @transform_12(%arg0: i32) -> (i32, i32) {
    %c0_i32 = arith.constant 0 : i32
    %c0_i32_0 = arith.constant 0 : i32
    %c0_i32_1 = arith.constant 0 : i32
    return %c0_i32, %c0_i32_0 : i32, i32
  }
  func.func @transform_13(%arg0: i32) -> (i32, i32) {
    %c0_i32 = arith.constant 0 : i32
    %c0_i32_0 = arith.constant 0 : i32
    %c0_i32_1 = arith.constant 0 : i32
    return %c0_i32, %c0_i32_0 : i32, i32
  }
  func.func @transform_14(%arg0: i32) -> (i32, i32) {
    %c0_i32 = arith.constant 0 : i32
    %c0_i32_0 = arith.constant 0 : i32
    %c0_i32_1 = arith.constant 0 : i32
    return %c0_i32, %c0_i32_0 : i32, i32
  }
  func.func @transform_15(%arg0: i32) -> (i32, i32) {
    %c0_i32 = arith.constant 0 : i32
    %c0_i32_0 = arith.constant 0 : i32
    %c0_i32_1 = arith.constant 0 : i32
    return %c0_i32, %c0_i32_0 : i32, i32
  }
  func.func @transform_16(%arg0: i32) -> (i32, i32) {
    %c0_i32 = arith.constant 0 : i32
    %c0_i32_0 = arith.constant 0 : i32
    %c0_i32_1 = arith.constant 0 : i32
    return %c0_i32, %c0_i32_0 : i32, i32
  }
  func.func @transform_17(%arg0: i32) -> (i32, i32) {
    %c0_i32 = arith.constant 0 : i32
    %c0_i32_0 = arith.constant 0 : i32
    %c0_i32_1 = arith.constant 0 : i32
    return %c0_i32, %c0_i32_0 : i32, i32
  }
  func.func @transform_18(%arg0: i32) -> (i32, i32) {
    %c0_i32 = arith.constant 0 : i32
    %c0_i32_0 = arith.constant 0 : i32
    %c0_i32_1 = arith.constant 0 : i32
    return %c0_i32, %c0_i32_0 : i32, i32
  }
  func.func @transform_19(%arg0: i32) -> (i32, i32, i32) {
    %c0_i32 = arith.constant 0 : i32
    %c0_i32_0 = arith.constant 0 : i32
    %c0_i32_1 = arith.constant 0 : i32
    return %arg0, %c0_i32, %c0_i32_0 : i32, i32, i32
  }
}

</mosaic_0001>

<bundles_post_ra>
// kernel: tpu_custom_call.1
= control target key start
LH: loop header
LB: loop body
LE: loop exit
PB: predicated region body
PF: predicated region fallthrough
CT: control target
= control target key end

     0   :  { %s2558_s0 = inlined_call_operand.vmem [shape: f32[2,16,32], index: 0, kind: input, shape index: {}]   ;;  %s2559_s1 = inlined_call_operand.hbm [shape: f32[2,8,16], index: 1, kind: input, shape index: {}]   ;;  %s2560_s2 = inlined_call_operand.vmem [shape: f32[48,48], index: 2, kind: input, shape index: {}]   ;;  %s2561_s3 = inlined_call_operand.hbm [shape: bf16[16,32], index: 3, kind: input, shape index: {}]   ;;  %s2562_s4 = inlined_call_operand.hbm [shape: f32[1,32], index: 4, kind: input, shape index: {}]   ;;  %s2563_s5 = inlined_call_operand.hbm [shape: f32[1,32], index: 5, kind: input, shape index: {}]   ;;  %s2564_s6 = inlined_call_operand.vmem [shape: f32[1,32], index: 6, kind: input, shape index: {}]   ;;  %s2565_s7 = inlined_call_operand.vmem [shape: bf16[32,256], index: 7, kind: input, shape index: {}]   ;;  %s2566_s8 = inlined_call_operand.vmem [shape: bf16[32,256], index: 8, kind: input, shape index: {}]   ;;  %s2567_s9 = inlined_call_operand.vmem [shape: bf16[32,256], index: 9, kind: input, shape index: {}]   ;;  %s2568_s10 = inlined_call_operand.vmem [shape: bf16[256,32], index: 10, kind: input, shape index: {}]   ;;  %s2569_s11 = inlined_call_operand.vmem [shape: f32[1,32], index: 11, kind: input, shape index: {}]   ;;  %s2570_s12 = inlined_call_operand.vmem [shape: f32[1,32], index: 12, kind: input, shape index: {}]   ;;  %s2571_s13 = inlined_call_operand.vmem [shape: f32[1,32], index: 13, kind: input, shape index: {}]   ;;  %s2572_s14 = inlined_call_operand.vmem [shape: bf16[32,256], index: 14, kind: input, shape index: {}]   ;;  %s2573_s15 = inlined_call_operand.vmem [shape: f32[1,256], index: 15, kind: input, shape index: {}]   ;;  %s2574_s16 = inlined_call_operand.vmem [shape: bf16[128,32], index: 16, kind: input, shape index: {}]   ;;  %s2575_s17 = inlined_call_operand.vmem [shape: f32[1,32], index: 17, kind: input, shape index: {}]   ;;  %s2576_s18 = inlined_call_operand.vmem [shape: f32[1,2], index: 18, kind: input, shape index: {}]   ;;  %s2577_s19 = inlined_call_operand.hbm [shape: f32[2,16,32], index: 19, kind: output, shape index: {}]  }
   0x1   :  { %2580 = sst [smem:[#allocation18_spill]] %s2558_s0 }
   0x2   :  { %2581 = sst [smem:[#allocation19_spill]] %s2559_s1 }
   0x3   :  { %2582 = sst [smem:[#allocation20_spill]] %s2560_s2 }
   0x4   :  { %2583 = sst [smem:[#allocation21_spill]] %s2561_s3 }
   0x5   :  { %2584 = sst [smem:[#allocation22_spill]] %s2577_s19 }
   0x6   :  { %24 = vsyncpa [#allocation3], 0 }
   0x7   :  { %25 = vsyncpa [#allocation7], 0 }
   0x8   :  { %26 = vsyncpa [#allocation10], 0 }
   0x9   :  { %27 = vsyncpa [#allocation5], 0  ;;  %s2585_s20 = sld [smem:[#allocation21_spill]] }
   0xf   :  { %s50_s21 = sshll.u32 %s2585_s20, 4  ;;  %s51_s21 = int_to_ptr.hbm [resolvable:$true] %s50_s21 }
  0x10   :  { %28 = vsyncpa [#allocation4], 0  ;;  %s1887_s1 = smov [#allocation6]   ;;  %s2586_s24 = sld [smem:[#allocation19_spill]] }
  0x11   :  { %s52_s22 = sshll.u32 %s1887_s1, 4  ;;  %s1888_s3 = smov 64   ;;  %s53_s22 = int_to_ptr.vmem [resolvable:$true] %s52_s22 }
  0x12   :  { %s1889_s26 = smov 4   ;;  %s1890_s27 = smov [#allocation2]  }
  0x13   :  { %58 = dma.hbm_to_vmem [thread:$0]  %s51_s21, 128, %s53_s22, [#allocation7], %s1888_s3, %s1888_s3, %s1889_s26  }
  0x14   :  { %s37_s28 = sshll.u32 %s1890_s27, 4  ;;  %s1891_s29 = smov 128   ;;  %s38_s28 = int_to_ptr.vmem [resolvable:$true] %s37_s28 }
  0x15   :  { %s1892_s19 = smov 8   ;;  %s64_s20 = sshll.u32 %s2562_s4, 4  ;;  %s65_s20 = int_to_ptr.hbm [resolvable:$true] %s64_s20 }
  0x16   :  { %s35_s25 = sshll.u32 %s2586_s24, 4  ;;  %s1893_s1 = smov [#allocation8]   ;;  %s36_s25 = int_to_ptr.hbm [resolvable:$true] %s35_s25 }
  0x17   :  { %43 = dma.hbm_to_vmem [thread:$0]  %s36_s25, 256, %s38_s28, [#allocation3], %s1891_s29, %s1891_s29, %s1892_s19  }
  0x18   :  { %s66_s2 = sshll.u32 %s1893_s1, 4  ;;  %s75_s22 = sshll.u32 %s2563_s5, 4  ;;  %s67_s2 = int_to_ptr.vmem [resolvable:$true] %s66_s2  ;;  %s76_s22 = int_to_ptr.hbm [resolvable:$true] %s75_s22 }
  0x19   :  { %69 = dma.hbm_to_vmem [thread:$0]  %s65_s20, 16, %s67_s2, [#allocation7]  }
  0x1a   :  { %s1894_s24 = smov [#allocation9]   ;;  %s110_s25 = sshll.u32 %s2576_s18, 4  ;;  %s111_s25 = int_to_ptr.vmem [resolvable:$true] %s110_s25 }
  0x1b   :  { %s77_s3 = sshll.u32 %s1894_s24, 4  ;;  %s1895_s4 = smov [#allocation11]   ;;  %s78_s3 = int_to_ptr.vmem [resolvable:$true] %s77_s3 }
  0x1c   :  { %80 = dma.hbm_to_vmem [thread:$0]  %s76_s22, 16, %s78_s3, [#allocation10]  }
  0x1d   :  { %113 = dma.vmem_to_smem %s111_s25, 16, %s1895_s4, [#allocation5]  }
  0x1e   :  { %1877 = dma.done.wait [#allocation3], 256  }
  0x1f   :  { %1878 = vsyncadd [#allocation3], 4294967040 }
  0x20   :  { %1879 = dma.done.wait [#allocation7], 144  }
  0x21   :  { %1880 = vsyncadd [#allocation7], 4294967152 }
  0x22   :  { %1881 = dma.done.wait [#allocation10], 16  }
  0x23   :  { %1882 = vsyncadd [#allocation10], 4294967280 }
  0x24   :  { %1883 = dma.done.wait [#allocation5], 16  }
  0x25   :  { %1884 = vsyncadd [#allocation5], 4294967280 }
  0x26   :  { %134 = sfence }
  0x27   :  { %s2587_s0 = sld [smem:[#allocation18_spill]]  ;;  %vm175_vm0 = vcmask 261120   ;;  %v1602_v1 = vld [vmem:[#allocation6] sm:$0xff]  ;;  %v140_v2 = vld [vmem:[#allocation2] sm:$0xff]  ;;  %v141_v4 = vld [vmem:[#allocation2 + $0x8] sm:$0xff]  ;;  %vm155_vm1 = vcmask 130048  }
  0x28   :  { %166 = vmatpush.bf16.msra.mxu0 %v1602_v1  ;;  %v142_v6 = vpack.c.bf16 %v141_v4, %v140_v2  ;;  %v1896_v10 = vmov 32.0   ;;  %v1656_v22 = vld [vmem:[#allocation8] ss:$0 sm:$0xff]  ;;  %v1423_v48 = vld [vmem:[%s2565_s7 + $0x10] sm:$0xf] }
  0x29   :  { %1663 = vrcp.f32 %v1896_v10  ;;  %v1606_v49 = vld [vmem:[%s2565_s7 + $0x14] sm:$0xf0]  ;;  %v1605_v50 = vld [vmem:[%s2565_s7 + $0x14] sm:$0xf]  ;;  %v1425_v52 = vld [vmem:[%s2565_s7 + $0x18] sm:$0xf0] }
  0x2a   :  { %v1424_v51 = vor.u32 %v1606_v49, %v1423_v48  ;;  %v1445_v53 = vld [vmem:[%s2566_s8 + $0x10] sm:$0xf]  ;;  %v1610_v54 = vld [vmem:[%s2566_s8 + $0x14] sm:$0xf0]  ;;  %v1428_v56 = vor.u32 %v1605_v50, %v1425_v52  ;;  %v1609_v58 = vld [vmem:[%s2566_s8 + $0x14] sm:$0xf] }
  0x2b   :  { %1412 = vmatmul.msk.bf16.vlgmr.msra.gmra.mxu0 %vm155_vm1, %v142_v6  ;;  %v1446_v57 = vor.u32 %v1610_v54, %v1445_v53  ;;  %v1447_v59 = vld [vmem:[%s2566_s8 + $0x18] sm:$0xf0]  ;;  %v1415_v2 = vld [vmem:[%s2565_s7] sm:$0xf]  ;;  %v1417_v6 = vld [vmem:[%s2565_s7 + $0x8] sm:$0xf0] }
  0x2c   :  { %375 = vmatpush.bf16.msra.mxu1 %v1424_v51  ;;  %v1450_v62 = vor.u32 %v1609_v58, %v1447_v59  ;;  %399 = vmatpush.bf16.msra.mxu2 %v1428_v56 }
  0x2d   :  { %v136_v0 = vld [vmem:[%s2587_s0] sm:$0xff]  ;;  %v139_v5 = vld [vmem:[%s2587_s0 + $0x18] sm:$0xff]  ;;  %v137_v8 = vld [vmem:[%s2587_s0 + $0x8] sm:$0xff]  ;;  %447 = vmatpush.bf16.msra.mxu3 %v1446_v57 }
  0x2e   :  { %v176_v3 = vsel %vm175_vm0, %v136_v0, 0.0  ;;  %v188_v7 = vsel %vm175_vm0, %v139_v5, 0.0  ;;  %v179_v9 = vsel %vm175_vm0, %v137_v8, 0.0  ;;  %v138_v28 = vld [vmem:[%s2587_s0 + $0x10] sm:$0xff]  ;;  %471 = vmatpush.bf16.msrb.mxu0 %v1450_v62 }
  0x2f   :  { %177 = vadd.xlane.f32.xlu0 %v176_v3  ;;  %189 = vadd.xlane.f32.xlu2 %v188_v7  ;;  %v1664_v11 = vpop.eup %1663  ;;  %v185_v31 = vsel %vm175_vm0, %v138_v28, 0.0  ;;  %v1604_v3 = vld [vmem:[%s2565_s7 + $0x4] sm:$0xf0]  ;;  %v1437_v7 = vld [vmem:[%s2566_s8] sm:$0xf] }
  0x30   :  { %v195_v12 = vmul.f32 32.0, %v1664_v11  ;;  %vm199_vm2 = vweird.f32 %v1664_v11  ;;  %v1416_v4 = vor.u32 %v1604_v3, %v1415_v2 }
  0x32   :  { %v196_v13 = vsub.f32 1.0, %v195_v12  ;;  %v1607_v12 = vld [vmem:[%s2566_s8 + $0x4] sm:$0xf]  ;;  %376 = vmatpush.bf16.msra.mxu1 %v1416_v4 }
  0x34   :  { %v197_v14 = vmul.f32 %v1664_v11, %v196_v13  ;;  %v1439_v13 = vld [vmem:[%s2566_s8 + $0x8] sm:$0xf0] }
  0x36   :  { %v198_v15 = vadd.f32 %v1664_v11, %v197_v14 }
  0x37   :  { %180 = vadd.xlane.f32.xlu0 %v179_v9 }
  0x38   :  { %v2028_v16 = vsel %vm199_vm2, %v1664_v11, %v198_v15  ;;  %v1608_v11 = vld [vmem:[%s2566_s8 + $0x4] sm:$0xf0] }
  0x39   :  { %v1438_v15 = vor.u32 %v1608_v11, %v1437_v7 }
  0x3b   :  { %448 = vmatpush.bf16.msra.mxu3 %v1438_v15 }
  0xa2   :  { %v178_v17 = vpop.xlane.xlu0 %177  ;;  %v190_v33 = vpop.xlane.xlu2 %189 }
  0xa3   :  { %v201_v18 = vmul.f32 %v2028_v16, %v178_v17  ;;  %v205_v35 = vmul.f32 %v2028_v16, %v190_v33  ;;  %v1442_v17 = vor.u32 %v1607_v12, %v1439_v13 }
  0xa5   :  { %v2031_v19 = vsub.f32 %v136_v0, %v201_v18  ;;  %v2048_v37 = vsub.f32 %v139_v5, %v205_v35  ;;  %v1603_v5 = vld [vmem:[%s2565_s7 + $0x4] sm:$0xf]  ;;  %472 = vmatpush.bf16.msrb.mxu0 %v1442_v17  ;;  %s2588_s7 = sld [smem:[#allocation20_spill]] }
  0xa6   :  { %v1420_v10 = vor.u32 %v1603_v5, %v1417_v6 }
  0xa7   :  { %v213_v20 = vmul.f32 %v2031_v19, %v2031_v19  ;;  %v217_v39 = vmul.f32 %v2048_v37, %v2048_v37 }
  0xa8   :  { %v168_v23 = vpop.f32.mrf.mxu0  ;;  %400 = vmatpush.bf16.msra.mxu2 %v1420_v10 }
  0xa9   :  { %v219_v21 = vsel %vm175_vm0, %v213_v20, 0.0  ;;  %v169_v24 = vadd.f32 %v1656_v22, %v168_v23  ;;  %v231_v40 = vsel %vm175_vm0, %v217_v39, 0.0 }
  0xaa   :  { %220 = vadd.xlane.f32.xlu0 %v219_v21  ;;  %v181_v25 = vpop.xlane.xlu0 %180 }
  0xab   :  { %v182_v26 = vsel %vm175_vm0, %v169_v24, 0.0  ;;  %v202_v27 = vmul.f32 %v2028_v16, %v181_v25 }
  0xac   :  { %183 = vadd.xlane.f32.xlu1 %v182_v26 }
  0xad   :  { %v2042_v32 = vsub.f32 %v137_v8, %v202_v27 }
  0xaf   :  { %v214_v36 = vmul.f32 %v2042_v32, %v2042_v32 }
  0xb0   :  { %v170_v29 = vpop.f32.mrf.mxu0 }
  0xb1   :  { %v171_v30 = vadd.f32 %v1656_v22, %v170_v29  ;;  %v222_v38 = vsel %vm175_vm0, %v214_v36, 0.0 }
  0xb3   :  { %v191_v34 = vsel %vm175_vm0, %v171_v30, 0.0 }
  0xb4   :  { %192 = vadd.xlane.f32.xlu2 %v191_v34  ;;  %186 = vadd.xlane.f32.xlu1 %v185_v31 }
  0xbc   :  { %223 = vadd.xlane.f32.xlu1 %v222_v38  ;;  %v2127_v38 = vld [vmem:[#allocation9] ss:$0 sm:$0xff] }
  0xc4   :  { %232 = vadd.xlane.f32.xlu1 %v231_v40 }
 0x11d   :  { %v221_v41 = vpop.xlane.xlu0 %220 }
 0x11e   :  { %v237_v42 = vmul.f32 %v221_v41, %v2028_v16 }
 0x11f   :  { %v184_v44 = vpop.xlane.xlu1 %183 }
 0x120   :  { %v2055_v43 = vadd.f32 1e-05, %v237_v42  ;;  %v203_v45 = vmul.f32 %v2028_v16, %v184_v44  ;;  %v2133_v42 = vld [vmem:[%s2564_s6] ss:$0 sm:$0xff] }
 0x122   :  { %1665 = vrsqrt.f32 %v2055_v43  ;;  %v2059_v46 = vsub.f32 %v169_v24, %v203_v45  ;;  %vm255_vm3 = vweird.f32 %v2055_v43 }
 0x124   :  { %v215_v47 = vmul.f32 %v2059_v46, %v2059_v46 }
 0x126   :  { %v225_v55 = vsel %vm175_vm0, %v215_v47, 0.0 }
 0x127   :  { %226 = vadd.xlane.f32.xlu2 %v225_v55  ;;  %v193_v60 = vpop.xlane.xlu2 %192  ;;  %v187_v61 = vpop.xlane.xlu1 %186 }
 0x128   :  { %v1666_v63 = vpop.eup %1665  ;;  %v206_v0 = vmul.f32 %v2028_v16, %v193_v60  ;;  %v204_v1 = vmul.f32 %v2028_v16, %v187_v61 }
 0x129   :  { %v250_v14 = vmul.f32 %v1666_v63, %v2055_v43  ;;  %vm256_vm4 = vweird.f32 %v1666_v63 }
 0x12a   :  { %v2105_v8 = vsub.f32 %v171_v30, %v206_v0  ;;  %v2107_v9 = vsub.f32 %v138_v28, %v204_v1  ;;  %vm257_vm5 = vmor %vm255_vm3, %vm256_vm4 }
 0x12b   :  { %v251_v23 = vmul.f32 %v1666_v63, %v250_v14 }
 0x12c   :  { %v218_v18 = vmul.f32 %v2105_v8, %v2105_v8  ;;  %v216_v20 = vmul.f32 %v2107_v9, %v2107_v9 }
 0x12d   :  { %v252_v27 = vmul.f32 0.5, %v251_v23 }
 0x12e   :  { %v234_v21 = vsel %vm175_vm0, %v218_v18, 0.0  ;;  %v228_v22 = vsel %vm175_vm0, %v216_v20, 0.0 }
 0x12f   :  { %235 = vadd.xlane.f32.xlu2 %v234_v21  ;;  %229 = vadd.xlane.f32.xlu0 %v228_v22  ;;  %v224_v24 = vpop.xlane.xlu1 %223  ;;  %v253_v28 = vsub.f32 1.5, %v252_v27 }
 0x130   :  { %v238_v25 = vmul.f32 %v224_v24, %v2028_v16  ;;  %v1467_v24 = vld [vmem:[%s2567_s9 + $0x10] sm:$0xf] }
 0x131   :  { %v254_v30 = vmul.f32 %v1666_v63, %v253_v28 }
 0x132   :  { %v244_v26 = vadd.f32 1e-05, %v238_v25  ;;  %v1614_v25 = vld [vmem:[%s2567_s9 + $0x14] sm:$0xf0] }
 0x133   :  { %v258_v34 = vsel %vm257_vm5, %v1666_v63, %v254_v30  ;;  %v1469_v30 = vld [vmem:[%s2567_s9 + $0x18] sm:$0xf0] }
 0x134   :  { %1667 = vrsqrt.f32 %v244_v26  ;;  %vm265_vm6 = vweird.f32 %v244_v26  ;;  %v309_v39 = vmul.f32 %v258_v34, %v2031_v19  ;;  %v1612_v34 = vld [vmem:[%s2567_s9 + $0x4] sm:$0xf0] }
 0x136   :  { %v318_v43 = vmul.f32 %v2127_v38, %v309_v39  ;;  %v1461_v39 = vld [vmem:[%s2567_s9 + $0x8] sm:$0xf0] }
 0x137   :  { %v233_v19 = vpop.xlane.xlu1 %232 }
 0x138   :  { %v327_v47 = vadd.f32 %v2133_v42, %v318_v43  ;;  %v241_v51 = vmul.f32 %v233_v19, %v2028_v16 }
 0x13a   :  { %v1668_v29 = vpop.eup %1667  ;;  %v2152_v53 = vadd.f32 1e-05, %v241_v51 }
 0x13b   :  { %v260_v31 = vmul.f32 %v1668_v29, %v244_v26  ;;  %vm266_vm7 = vweird.f32 %v1668_v29  ;;  %v1613_v26 = vld [vmem:[%s2567_s9 + $0x14] sm:$0xf] }
 0x13c   :  { %vm267_vm8 = vmor %vm265_vm6, %vm266_vm7  ;;  %vm295_vm15 = vweird.f32 %v2152_v53  ;;  %vm617_vm6 = vcmask 392192  }
 0x13d   :  { %v261_v33 = vmul.f32 %v1668_v29, %v260_v31  ;;  %v1472_v31 = vor.u32 %v1613_v26, %v1469_v30 }
 0x13f   :  { %v262_v35 = vmul.f32 0.5, %v261_v33  ;;  %v1459_v33 = vld [vmem:[%s2567_s9] sm:$0xf]  ;;  %543 = vmatpush.bf16.msrb.mxu2 %v1472_v31 }
 0x141   :  { %v263_v36 = vsub.f32 1.5, %v262_v35  ;;  %v1611_v35 = vld [vmem:[%s2567_s9 + $0x4] sm:$0xf] }
 0x143   :  { %v264_v40 = vmul.f32 %v1668_v29, %v263_v36  ;;  %v1460_v36 = vor.u32 %v1612_v34, %v1459_v33 }
 0x145   :  { %v268_v41 = vsel %vm267_vm8, %v1668_v29, %v264_v40  ;;  %v1468_v29 = vor.u32 %v1614_v25, %v1467_v24 }
 0x146   :  { %v310_v44 = vmul.f32 %v268_v41, %v2042_v32  ;;  %v1464_v41 = vor.u32 %v1611_v35, %v1461_v39 }
 0x147   :  { %519 = vmatpush.bf16.msra.mxu0 %v1468_v29  ;;  %1643 = vmatpush.bf16.msrb.mxu1 %v1468_v29 }
 0x148   :  { %v319_v45 = vmul.f32 %v2127_v38, %v310_v44  ;;  %544 = vmatpush.bf16.msrb.mxu2 %v1464_v41 }
 0x14a   :  { %v328_v48 = vadd.f32 %v2133_v42, %v319_v45 }
 0x14b   :  { %520 = vmatpush.bf16.msra.mxu0 %v1460_v36  ;;  %1644 = vmatpush.bf16.msrb.mxu1 %v1460_v36 }
 0x14c   :  { %v2140_v49 = vpack.c.bf16 %v328_v48, %v327_v47 }
 0x14e   :  { %1429 = vmatmul.msk.bf16.vlgmr.msra.gmra.mxu1 %vm175_vm0, %v2140_v49  ;;  %1432 = vmatmul.msk.bf16.vlgmr.msra.gmra.mxu2 %vm175_vm0, %v2140_v49 }
 0x14f   :  { %1451 = vmatmul.msk.bf16.vlgmr.msra.gmra.mxu3 %vm175_vm0, %v2140_v49  ;;  %1454 = vmatmul.msk.bf16.vlgmr.msrb.gmra.mxu0 %vm175_vm0, %v2140_v49 }
 0x19a   :  { %v227_v32 = vpop.xlane.xlu2 %226 }
 0x19b   :  { %v239_v50 = vmul.f32 %v227_v32, %v2028_v16 }
 0x19d   :  { %v245_v52 = vadd.f32 1e-05, %v239_v50 }
 0x19f   :  { %1669 = vrsqrt.f32 %v245_v52  ;;  %vm275_vm10 = vweird.f32 %v245_v52 }
 0x1a0   :  { %1671 = vrsqrt.f32 %v2152_v53 }
 0x1a2   :  { %v236_v54 = vpop.xlane.xlu2 %235  ;;  %v230_v55 = vpop.xlane.xlu0 %229 }
 0x1a3   :  { %v242_v56 = vmul.f32 %v236_v54, %v2028_v16  ;;  %v240_v57 = vmul.f32 %v230_v55, %v2028_v16 }
 0x1a5   :  { %v1670_v58 = vpop.eup %1669  ;;  %v248_v59 = vadd.f32 1e-05, %v242_v56  ;;  %v246_v60 = vadd.f32 1e-05, %v240_v57 }
 0x1a6   :  { %v270_v61 = vmul.f32 %v1670_v58, %v245_v52  ;;  %v2157_v0 = vpop.eup %1671  ;;  %vm276_vm9 = vweird.f32 %v1670_v58 }
 0x1a7   :  { %1673 = vrsqrt.f32 %v248_v59  ;;  %v290_v4 = vmul.f32 %v2157_v0, %v2152_v53  ;;  %vm277_vm11 = vmor %vm275_vm10, %vm276_vm9  ;;  %vm285_vm13 = vweird.f32 %v246_v60  ;;  %vm296_vm1 = vweird.f32 %v2157_v0 }
 0x1a8   :  { %v271_v62 = vmul.f32 %v1670_v58, %v270_v61  ;;  %1675 = vrsqrt.f32 %v246_v60  ;;  %vm297_vm3 = vmor %vm295_vm15, %vm296_vm1  ;;  %vm305_vm4 = vweird.f32 %v248_v59 }
 0x1a9   :  { %v291_v12 = vmul.f32 %v2157_v0, %v290_v4 }
 0x1aa   :  { %v272_v63 = vmul.f32 0.5, %v271_v62 }
 0x1ab   :  { %v292_v18 = vmul.f32 0.5, %v291_v12 }
 0x1ac   :  { %v273_v1 = vsub.f32 1.5, %v272_v63 }
 0x1ad   :  { %v2159_v2 = vpop.eup %1673  ;;  %v293_v27 = vsub.f32 1.5, %v292_v18 }
 0x1ae   :  { %v1676_v3 = vpop.eup %1675  ;;  %v300_v5 = vmul.f32 %v2159_v2, %v248_v59  ;;  %v274_v6 = vmul.f32 %v1670_v58, %v273_v1  ;;  %vm306_vm2 = vweird.f32 %v2159_v2 }
 0x1af   :  { %v280_v7 = vmul.f32 %v1676_v3, %v246_v60  ;;  %vm286_vm12 = vweird.f32 %v1676_v3  ;;  %v294_v45 = vmul.f32 %v2157_v0, %v293_v27  ;;  %vm307_vm5 = vmor %vm305_vm4, %vm306_vm2 }
 0x1b0   :  { %v301_v10 = vmul.f32 %v2159_v2, %v300_v5  ;;  %v278_v13 = vsel %vm277_vm11, %v1670_v58, %v274_v6  ;;  %vm287_vm14 = vmor %vm285_vm13, %vm286_vm12 }
 0x1b1   :  { %v281_v11 = vmul.f32 %v1676_v3, %v280_v7  ;;  %v311_v20 = vmul.f32 %v278_v13, %v2059_v46  ;;  %v298_v19 = vsel %vm297_vm3, %v2157_v0, %v294_v45 }
 0x1b2   :  { %v302_v15 = vmul.f32 0.5, %v301_v10  ;;  %v313_v50 = vmul.f32 %v298_v19, %v2048_v37  ;;  %v561_v19 = vld [vmem:[%s2588_s7] sm:$0xff] }
 0x1b3   :  { %v282_v14 = vmul.f32 0.5, %v281_v11  ;;  %v320_v46 = vmul.f32 %v2127_v38, %v311_v20 }
 0x1b4   :  { %v303_v22 = vsub.f32 1.5, %v302_v15  ;;  %v322_v52 = vmul.f32 %v2127_v38, %v313_v50 }
 0x1b5   :  { %v283_v17 = vsub.f32 1.5, %v282_v14  ;;  %v329_v43 = vadd.f32 %v2133_v42, %v320_v46 }
 0x1b6   :  { %v304_v40 = vmul.f32 %v2159_v2, %v303_v22  ;;  %v331_v54 = vadd.f32 %v2133_v42, %v322_v52 }
 0x1b7   :  { %v284_v21 = vmul.f32 %v1676_v3, %v283_v17 }
 0x1b8   :  { %v308_v48 = vsel %vm307_vm5, %v2159_v2, %v304_v40 }
 0x1b9   :  { %v288_v23 = vsel %vm287_vm14, %v1676_v3, %v284_v21  ;;  %v314_v32 = vmul.f32 %v308_v48, %v2105_v8 }
 0x1ba   :  { %v312_v28 = vmul.f32 %v288_v23, %v2107_v9 }
 0x1bb   :  { %v323_v51 = vmul.f32 %v2127_v38, %v314_v32 }
 0x1bc   :  { %v321_v9 = vmul.f32 %v2127_v38, %v312_v28 }
 0x1bd   :  { %v332_v53 = vadd.f32 %v2133_v42, %v323_v51 }
 0x1be   :  { %v330_v44 = vadd.f32 %v2133_v42, %v321_v9 }
 0x1bf   :  { %v335_v55 = vpack.c.bf16 %v332_v53, %v331_v54 }
 0x1c0   :  { %v334_v47 = vpack.c.bf16 %v330_v44, %v329_v43 }
 0x1c2   :  { %1430 = vmatmul.msk.bf16.gmra.mxu1 %vm175_vm0, %v334_v47  ;;  %1433 = vmatmul.msk.bf16.gmra.mxu2 %vm175_vm0, %v334_v47 }
 0x1c3   :  { %1452 = vmatmul.msk.bf16.gmra.mxu3 %vm175_vm0, %v334_v47  ;;  %1455 = vmatmul.msk.bf16.gmra.mxu0 %vm175_vm0, %v334_v47 }
 0x1cb   :  { %v378_v37 = vpop.f32.mrf.mxu1 }
 0x1cc   :  { %v474_v8 = vpop.f32.mrf.mxu0 }
 0x1d1   :  { %v402_v38 = vpop.f32.mrf.mxu2 }
 0x1d2   :  { %1431 = vmatmul.msk.bf16.gmra.mxu1 %vm175_vm0, %v335_v55  ;;  %1434 = vmatmul.msk.bf16.gmra.mxu2 %vm175_vm0, %v335_v55  ;;  %v450_v42 = vpop.f32.mrf.mxu3 }
 0x1d3   :  { %1453 = vmatmul.msk.bf16.gmra.mxu3 %vm175_vm0, %v335_v55  ;;  %1456 = vmatmul.msk.bf16.gmra.mxu0 %vm175_vm0, %v335_v55  ;;  %v380_v56 = vpop.f32.mrf.mxu1 }
 0x1d4   :  { %v476_v57 = vpop.f32.mrf.mxu0  ;;  %v572_v28 = vpack.c.bf16 %v380_v56, %v378_v37 }
 0x1d5   :  { %v816_v22 = vpack.c.bf16 %v476_v57, %v474_v8 }
 0x1d9   :  { %v404_v58 = vpop.f32.mrf.mxu2 }
 0x1da   :  { %v452_v59 = vpop.f32.mrf.mxu3  ;;  %v813_v26 = vpack.c.bf16 %v404_v58, %v402_v38 }
 0x1db   :  { %v575_v24 = vpack.c.bf16 %v452_v59, %v450_v42 }
 0x1e2   :  { %1474 = vmatmul.msk.bf16.vlgmr.msrb.gmra.mxu1 %vm175_vm0, %v334_v47  ;;  %1476 = vmatmul.msk.bf16.vlgmr.msrb.gmra.mxu2 %vm175_vm0, %v2140_v49 }
 0x1e3   :  { %1473 = vmatmul.msk.bf16.vlgmr.msra.gmra.mxu0 %vm175_vm0, %v2140_v49 }
 0x1f2   :  { %1475 = vmatmul.msk.bf16.gmra.mxu1 %vm175_vm0, %v335_v55  ;;  %1477 = vmatmul.msk.bf16.gmra.mxu2 %vm175_vm0, %v334_v47 }
 0x202   :  { %1478 = vmatmul.msk.bf16.gmra.mxu2 %vm175_vm0, %v335_v55  ;;  %v562_v55 = vld [vmem:[%s2588_s7 + $0x8] sm:$0xff] }
 0x23f   :  { %v383_v60 = vpop.f32.mrf.mxu1 }
 0x240   :  { %v479_v61 = vpop.f32.mrf.mxu0 }
 0x245   :  { %v407_v62 = vpop.f32.mrf.mxu2 }
 0x246   :  { %v455_v63 = vpop.f32.mrf.mxu3 }
 0x247   :  { %v385_v0 = vpop.f32.mrf.mxu1 }
 0x248   :  { %v481_v49 = vpop.f32.mrf.mxu0  ;;  %v573_v39 = vpack.c.bf16 %v385_v0, %v383_v60  ;;  %v563_v60 = vld [vmem:[%s2588_s7 + $0x10] sm:$0xff] }
 0x249   :  { %v817_v17 = vpack.c.bf16 %v481_v49, %v479_v61 }
 0x24d   :  { %v409_v1 = vpop.f32.mrf.mxu2 }
 0x24e   :  { %v457_v2 = vpop.f32.mrf.mxu3  ;;  %v814_v35 = vpack.c.bf16 %v409_v1, %v407_v62 }
 0x24f   :  { %v388_v3 = vpop.f32.mrf.mxu1  ;;  %v576_v20 = vpack.c.bf16 %v457_v2, %v455_v63 }
 0x250   :  { %v484_v4 = vpop.f32.mrf.mxu0 }
 0x255   :  { %v412_v5 = vpop.f32.mrf.mxu2 }
 0x256   :  { %v460_v6 = vpop.f32.mrf.mxu3 }
 0x257   :  { %v390_v7 = vpop.f32.mrf.mxu1 }
 0x258   :  { %v486_v10 = vpop.f32.mrf.mxu0  ;;  %v574_v45 = vpack.c.bf16 %v390_v7, %v388_v3 }
 0x259   :  { %v818_v11 = vpack.c.bf16 %v486_v10, %v484_v4  ;;  %v564_v4 = vld [vmem:[%s2588_s7 + $0x18] sm:$0xff] }
 0x25b   :  { %827 = vmatpush.bf16.xpose.msra.mxu2 %v818_v11 }
 0x25d   :  { %v414_v12 = vpop.f32.mrf.mxu2 }
 0x25e   :  { %v462_v13 = vpop.f32.mrf.mxu3  ;;  %v815_v43 = vpack.c.bf16 %v414_v12, %v412_v5 }
 0x25f   :  { %v577_v14 = vpack.c.bf16 %v462_v13, %v460_v6  ;;  %v527_v15 = vpop.f32.mrf.mxu1 }
 0x260   :  { %v522_v27 = vpop.f32.mrf.mxu0 }
 0x261   :  { %586 = vmatpush.bf16.xpose.msrb.mxu3 %v577_v14 }
 0x263   :  { %828 = vmatpush.bf16.xpose.msra.mxu2 %v817_v17 }
 0x265   :  { %v546_v18 = vpop.f32.mrf.mxu2 }
 0x267   :  { %v529_v21 = vpop.f32.mrf.mxu1 }
 0x268   :  { %v579_v31 = vpack.c.bf16 %v529_v21, %v527_v15  ;;  %v524_v33 = vpop.f32.mrf.mxu0  ;;  %v565_v15 = vld [vmem:[%s2588_s7 + $0x20] sm:$0xff] }
 0x269   :  { %587 = vmatpush.bf16.xpose.msrb.mxu3 %v576_v20  ;;  %v578_v9 = vpack.c.bf16 %v524_v33, %v522_v27 }
 0x26b   :  { %829 = vmatpush.bf16.xpose.msra.mxu2 %v816_v22 }
 0x26d   :  { %v548_v23 = vpop.f32.mrf.mxu2 }
 0x26e   :  { %v819_v47 = vpack.c.bf16 %v548_v23, %v546_v18 }
 0x26f   :  { %v532_v25 = vpop.f32.mrf.mxu1 }
 0x271   :  { %588 = vmatpush.bf16.xpose.msrb.mxu3 %v575_v24 }
 0x272   :  { %830 = vmatmul.bf16.vlgmr.msra.gmra.mxu2 %v813_v26  ;;  %v566_v26 = vld [vmem:[%s2588_s7 + $0x28] sm:$0xff] }
 0x275   :  { %v551_v46 = vpop.f32.mrf.mxu2 }
 0x277   :  { %v534_v29 = vpop.f32.mrf.mxu1 }
 0x278   :  { %v580_v30 = vpack.c.bf16 %v534_v29, %v532_v25  ;;  %589 = vmatmul.bf16.vlgmr.msrb.gmra.mxu3 %v572_v28 }
 0x27a   :  { %701 = vmatpush.bf16.msrb.mxu0 %v580_v30 }
 0x27d   :  { %v553_v34 = vpop.f32.mrf.mxu2 }
 0x27e   :  { %702 = vmatpush.bf16.msrb.mxu0 %v579_v31  ;;  %v820_v44 = vpack.c.bf16 %v553_v34, %v551_v46 }
 0x282   :  { %835 = vmatmul.bf16.gmra.mxu2 %v814_v35  ;;  %703 = vmatpush.bf16.msrb.mxu0 %v578_v9 }
 0x285   :  { %v556_v36 = vpop.f32.mrf.mxu2 }
 0x288   :  { %594 = vmatmul.bf16.gmra.mxu3 %v573_v39 }
 0x28d   :  { %v558_v40 = vpop.f32.mrf.mxu2 }
 0x28e   :  { %v821_v41 = vpack.c.bf16 %v558_v40, %v556_v36 }
 0x290   :  { %941 = vmatpush.bf16.msra.mxu3 %v821_v41 }
 0x292   :  { %840 = vmatmul.bf16.gmra.mxu2 %v815_v43 }
 0x294   :  { %942 = vmatpush.bf16.msra.mxu3 %v820_v44 }
 0x298   :  { %599 = vmatmul.bf16.gmra.mxu3 %v574_v45 }
 0x299   :  { %943 = vmatpush.bf16.msra.mxu3 %v819_v47 }
 0x2f5   :  { %v831_v48 = vpop.f32.mrf.mxu2 }
 0x2f6   :  { %v846_v32 = vmul.f32 0.088388346, %v831_v48 }
 0x2f8   :  { %v2228_v50 = vadd.f32 %v846_v32, %v561_v19 }
 0x2fa   :  { %v858_v51 = vsel %vm617_vm6, %v2228_v50, -inf }
 0x2fb   :  { %v590_v52 = vpop.f32.mrf.mxu3  ;;  %859 = vmax.xlane.f32.xlu0 %v858_v51 }
 0x2fc   :  { %v605_v53 = vmul.f32 0.088388346, %v590_v52 }
 0x2fd   :  { %v833_v54 = vpop.f32.mrf.mxu2 }
 0x2fe   :  { %v847_v37 = vmul.f32 0.088388346, %v833_v54  ;;  %v611_v8 = vadd.f32 %v605_v53, %v561_v19 }
 0x300   :  { %v618_v38 = vsel %vm617_vm6, %v611_v8, -inf  ;;  %v2236_v42 = vadd.f32 %v847_v37, %v562_v55 }
 0x301   :  { %619 = vmax.xlane.f32.xlu2 %v618_v38 }
 0x302   :  { %v861_v56 = vsel %vm617_vm6, %v2236_v42, -inf }
 0x303   :  { %v592_v57 = vpop.f32.mrf.mxu3  ;;  %862 = vmax.xlane.f32.xlu1 %v861_v56 }
 0x304   :  { %v606_v58 = vmul.f32 0.088388346, %v592_v57 }
 0x305   :  { %v836_v59 = vpop.f32.mrf.mxu2 }
 0x306   :  { %v848_v61 = vmul.f32 0.088388346, %v836_v59  ;;  %v2243_v62 = vadd.f32 %v606_v58, %v562_v55 }
 0x308   :  { %v621_v63 = vsel %vm617_vm6, %v2243_v62, -inf  ;;  %v2247_v0 = vadd.f32 %v848_v61, %v563_v60 }
 0x309   :  { %622 = vmax.xlane.f32.xlu0 %v621_v63 }
 0x30a   :  { %v864_v49 = vsel %vm617_vm6, %v2247_v0, -inf }
 0x30b   :  { %865 = vmax.xlane.f32.xlu1 %v864_v49  ;;  %v595_v1 = vpop.f32.mrf.mxu3 }
 0x30c   :  { %v607_v2 = vmul.f32 0.088388346, %v595_v1 }
 0x30d   :  { %v838_v3 = vpop.f32.mrf.mxu2 }
 0x30e   :  { %v849_v5 = vmul.f32 0.088388346, %v838_v3  ;;  %v2254_v6 = vadd.f32 %v607_v2, %v563_v60 }
 0x310   :  { %v624_v7 = vsel %vm617_vm6, %v2254_v6, -inf  ;;  %v2258_v10 = vadd.f32 %v849_v5, %v564_v4 }
 0x311   :  { %625 = vmax.xlane.f32.xlu0 %v624_v7 }
 0x312   :  { %v867_v11 = vsel %vm617_vm6, %v2258_v10, -inf }
 0x313   :  { %868 = vmax.xlane.f32.xlu2 %v867_v11  ;;  %v597_v12 = vpop.f32.mrf.mxu3 }
 0x314   :  { %v608_v13 = vmul.f32 0.088388346, %v597_v12 }
 0x315   :  { %v841_v14 = vpop.f32.mrf.mxu2 }
 0x316   :  { %v850_v17 = vmul.f32 0.088388346, %v841_v14  ;;  %v2265_v18 = vadd.f32 %v608_v13, %v564_v4 }
 0x318   :  { %v627_v20 = vsel %vm617_vm6, %v2265_v18, -inf  ;;  %v2269_v21 = vadd.f32 %v850_v17, %v565_v15 }
 0x319   :  { %628 = vmax.xlane.f32.xlu1 %v627_v20 }
 0x31a   :  { %v870_v22 = vsel %vm617_vm6, %v2269_v21, -inf }
 0x31b   :  { %871 = vmax.xlane.f32.xlu2 %v870_v22  ;;  %v600_v23 = vpop.f32.mrf.mxu3 }
 0x31c   :  { %v609_v24 = vmul.f32 0.088388346, %v600_v23 }
 0x31d   :  { %v843_v25 = vpop.f32.mrf.mxu2 }
 0x31e   :  { %v851_v27 = vmul.f32 0.088388346, %v843_v25  ;;  %v2276_v46 = vadd.f32 %v609_v24, %v565_v15 }
 0x320   :  { %v630_v28 = vsel %vm617_vm6, %v2276_v46, -inf  ;;  %v2280_v29 = vadd.f32 %v851_v27, %v566_v26 }
 0x321   :  { %631 = vmax.xlane.f32.xlu1 %v630_v28 }
 0x322   :  { %v873_v30 = vsel %vm617_vm6, %v2280_v29, -inf }
 0x323   :  { %874 = vmax.xlane.f32.xlu0 %v873_v30  ;;  %v602_v31 = vpop.f32.mrf.mxu3 }
 0x324   :  { %v610_v33 = vmul.f32 0.088388346, %v602_v31 }
 0x326   :  { %v2284_v34 = vadd.f32 %v610_v33, %v566_v26 }
 0x328   :  { %v633_v35 = vsel %vm617_vm6, %v2284_v34, -inf }
 0x329   :  { %634 = vmax.xlane.f32.xlu2 %v633_v35 }
 0x36e   :  { %v860_v9 = vpop.xlane.xlu0 %859 }
 0x36f   :  { %v876_v36 = vsub.f32 %v2228_v50, %v860_v9 }
 0x371   :  { %v882_v39 = vmul.f32 1.442695, %v876_v36 }
 0x373   :  { %1677 = vpow2.f32 %v882_v39 }
 0x374   :  { %v620_v40 = vpop.xlane.xlu2 %619 }
 0x375   :  { %v636_v41 = vsub.f32 %v611_v8, %v620_v40 }
 0x376   :  { %v863_v43 = vpop.xlane.xlu1 %862 }
 0x377   :  { %v642_v44 = vmul.f32 1.442695, %v636_v41  ;;  %v877_v45 = vsub.f32 %v2236_v42, %v863_v43 }
 0x379   :  { %v2290_v47 = vpop.eup %1677  ;;  %1679 = vpow2.f32 %v642_v44  ;;  %v884_v48 = vmul.f32 1.442695, %v877_v45 }
 0x37a   :  { %v894_v19 = vsel %vm617_vm6, %v2290_v47, 0.0 }
 0x37b   :  { %1681 = vpow2.f32 %v884_v48  ;;  %895 = vadd.xlane.f32.xlu0 %v894_v19 }
 0x37c   :  { %v623_v32 = vpop.xlane.xlu0 %622 }
 0x37d   :  { %v637_v50 = vsub.f32 %v2243_v62, %v623_v32 }
 0x37e   :  { %v866_v51 = vpop.xlane.xlu1 %865 }
 0x37f   :  { %v2295_v52 = vpop.eup %1679  ;;  %v644_v53 = vmul.f32 1.442695, %v637_v50  ;;  %v878_v54 = vsub.f32 %v2247_v0, %v866_v51 }
 0x380   :  { %v654_v55 = vsel %vm617_vm6, %v2295_v52, 0.0 }
 0x381   :  { %v2300_v37 = vpop.eup %1681  ;;  %1683 = vpow2.f32 %v644_v53  ;;  %v886_v8 = vmul.f32 1.442695, %v878_v54  ;;  %655 = vadd.xlane.f32.xlu2 %v654_v55  ;;  %v1630_v54 = vld [vmem:[%s2568_s10 + $0x78] sm:$0xff]  ;;  %v1629_v55 = vld [vmem:[%s2568_s10 + $0x70] sm:$0xff] }
 0x382   :  { %v897_v38 = vsel %vm617_vm6, %v2300_v37, 0.0  ;;  %1027 = vmatpush.bf16.msra.mxu0 %v1630_v54 }
 0x383   :  { %1685 = vpow2.f32 %v886_v8  ;;  %898 = vadd.xlane.f32.xlu1 %v897_v38 }
 0x384   :  { %v626_v42 = vpop.xlane.xlu0 %625 }
 0x385   :  { %v638_v56 = vsub.f32 %v2254_v6, %v626_v42 }
 0x386   :  { %v869_v57 = vpop.xlane.xlu2 %868  ;;  %1028 = vmatpush.bf16.msra.mxu0 %v1629_v55  ;;  %v1741_v55 = vld [vmem:[%s2587_s0] sm:$0xff] }
 0x387   :  { %v2305_v58 = vpop.eup %1683  ;;  %v646_v59 = vmul.f32 1.442695, %v638_v56  ;;  %v879_v60 = vsub.f32 %v2258_v10, %v869_v57  ;;  %v1620_v57 = vld [vmem:[%s2568_s10 + $0x28] sm:$0xff] }
 0x388   :  { %v657_v61 = vsel %vm617_vm6, %v2305_v58, 0.0 }
 0x389   :  { %v2310_v62 = vpop.eup %1685  ;;  %1687 = vpow2.f32 %v646_v59  ;;  %v888_v63 = vmul.f32 1.442695, %v879_v60  ;;  %658 = vadd.xlane.f32.xlu0 %v657_v61 }
 0x38a   :  { %v900_v0 = vsel %vm617_vm6, %v2310_v62, 0.0 }
 0x38b   :  { %1689 = vpow2.f32 %v888_v63  ;;  %901 = vadd.xlane.f32.xlu1 %v900_v0  ;;  %v1627_v0 = vld [vmem:[%s2568_s10 + $0x60] sm:$0xff] }
 0x38c   :  { %v629_v49 = vpop.xlane.xlu1 %628 }
 0x38d   :  { %v639_v1 = vsub.f32 %v2265_v18, %v629_v49 }
 0x38e   :  { %v872_v2 = vpop.xlane.xlu2 %871 }
 0x38f   :  { %v2315_v3 = vpop.eup %1687  ;;  %v648_v4 = vmul.f32 1.442695, %v639_v1  ;;  %v880_v5 = vsub.f32 %v2269_v21, %v872_v2 }
 0x390   :  { %v660_v6 = vsel %vm617_vm6, %v2315_v3, 0.0 }
 0x391   :  { %v2320_v7 = vpop.eup %1689  ;;  %1691 = vpow2.f32 %v648_v4  ;;  %v890_v10 = vmul.f32 1.442695, %v880_v5  ;;  %661 = vadd.xlane.f32.xlu0 %v660_v6  ;;  %v1618_v5 = vld [vmem:[%s2568_s10 + $0x18] sm:$0xff] }
 0x392   :  { %v903_v11 = vsel %vm617_vm6, %v2320_v7, 0.0  ;;  %v1626_v6 = vld [vmem:[%s2568_s10 + $0x58] sm:$0xff] }
 0x393   :  { %1693 = vpow2.f32 %v890_v10  ;;  %904 = vadd.xlane.f32.xlu2 %v903_v11 }
 0x394   :  { %v632_v12 = vpop.xlane.xlu1 %631 }
 0x395   :  { %v640_v13 = vsub.f32 %v2276_v46, %v632_v12 }
 0x396   :  { %v875_v14 = vpop.xlane.xlu0 %874 }
 0x397   :  { %v2325_v15 = vpop.eup %1691  ;;  %v650_v17 = vmul.f32 1.442695, %v640_v13  ;;  %v881_v18 = vsub.f32 %v2280_v29, %v875_v14 }
 0x398   :  { %v663_v20 = vsel %vm617_vm6, %v2325_v15, 0.0 }
 0x399   :  { %v2330_v21 = vpop.eup %1693  ;;  %1695 = vpow2.f32 %v650_v17  ;;  %v892_v22 = vmul.f32 1.442695, %v881_v18  ;;  %664 = vadd.xlane.f32.xlu1 %v663_v20 }
 0x39a   :  { %v906_v23 = vsel %vm617_vm6, %v2330_v21, 0.0 }
 0x39b   :  { %1697 = vpow2.f32 %v892_v22  ;;  %907 = vadd.xlane.f32.xlu2 %v906_v23  ;;  %v1617_v23 = vld [vmem:[%s2568_s10 + $0x10] sm:$0xff] }
 0x39c   :  { %v635_v24 = vpop.xlane.xlu2 %634 }
 0x39d   :  { %v641_v25 = vsub.f32 %v2284_v34, %v635_v24  ;;  %v1616_v24 = vld [vmem:[%s2568_s10 + $0x8] sm:$0xff] }
 0x39f   :  { %v2335_v26 = vpop.eup %1695  ;;  %v652_v27 = vmul.f32 1.442695, %v641_v25  ;;  %v1624_v25 = vld [vmem:[%s2568_s10 + $0x48] sm:$0xff] }
 0x3a0   :  { %v666_v46 = vsel %vm617_vm6, %v2335_v26, 0.0 }
 0x3a1   :  { %v2339_v28 = vpop.eup %1697  ;;  %1699 = vpow2.f32 %v652_v27  ;;  %667 = vadd.xlane.f32.xlu1 %v666_v46  ;;  %v1623_v27 = vld [vmem:[%s2568_s10 + $0x40] sm:$0xff] }
 0x3a2   :  { %v909_v29 = vsel %vm617_vm6, %v2339_v28, 0.0 }
 0x3a3   :  { %910 = vadd.xlane.f32.xlu0 %v909_v29 }
 0x3a7   :  { %v2343_v30 = vpop.eup %1699 }
 0x3a8   :  { %v669_v31 = vsel %vm617_vm6, %v2343_v30, 0.0 }
 0x3a9   :  { %670 = vadd.xlane.f32.xlu2 %v669_v31 }
 0x3ee   :  { %v896_v33 = vpop.xlane.xlu0 %895 }
 0x3ef   :  { %1701 = vrcp.f32 %v896_v33 }
 0x3f4   :  { %v656_v35 = vpop.xlane.xlu2 %655 }
 0x3f5   :  { %v1702_v9 = vpop.eup %1701 }
 0x3f6   :  { %v899_v34 = vpop.xlane.xlu1 %898  ;;  %v918_v40 = vmul.f32 %v1702_v9, %v2290_v47  ;;  %v1622_v47 = vld [vmem:[%s2568_s10 + $0x38] sm:$0xff] }
 0x3f7   :  { %1703 = vrcp.f32 %v899_v34  ;;  %787 = vmatpush.bf16.msra.mxu1 %v1622_v47 }
 0x3f8   :  { %1705 = vrcp.f32 %v656_v35 }
 0x3fc   :  { %v659_v36 = vpop.xlane.xlu0 %658 }
 0x3fd   :  { %v1704_v39 = vpop.eup %1703  ;;  %1707 = vrcp.f32 %v659_v36 }
 0x3fe   :  { %v919_v41 = vmul.f32 %v1704_v39, %v2300_v37  ;;  %v1706_v44 = vpop.eup %1705  ;;  %v902_v45 = vpop.xlane.xlu1 %901 }
 0x3ff   :  { %v678_v19 = vmul.f32 %v1706_v44, %v2295_v52  ;;  %1709 = vrcp.f32 %v902_v45  ;;  %v1621_v52 = vld [vmem:[%s2568_s10 + $0x30] sm:$0xff] }
 0x400   :  { %v924_v43 = vpack.c.bf16 %v919_v41, %v918_v40  ;;  %788 = vmatpush.bf16.msra.mxu1 %v1621_v52 }
 0x402   :  { %1514 = vmatmul.msk.bf16.vlgmr.msra.gmra.mxu3 %vm617_vm6, %v924_v43 }
 0x403   :  { %v1708_v48 = vpop.eup %1707 }
 0x404   :  { %v679_v32 = vmul.f32 %v1708_v48, %v2305_v58  ;;  %v662_v53 = vpop.xlane.xlu0 %661  ;;  %v1628_v58 = vld [vmem:[%s2568_s10 + $0x68] sm:$0xff]  ;;  %789 = vmatpush.bf16.msra.mxu1 %v1620_v57 }
 0x405   :  { %v1710_v37 = vpop.eup %1709  ;;  %1029 = vmatpush.bf16.msra.mxu0 %v1628_v58 }
 0x406   :  { %v684_v50 = vpack.c.bf16 %v679_v32, %v678_v19  ;;  %v905_v51 = vpop.xlane.xlu2 %904  ;;  %v920_v42 = vmul.f32 %v1710_v37, %v2310_v62  ;;  %v1619_v62 = vld [vmem:[%s2568_s10 + $0x20] sm:$0xff] }
 0x407   :  { %1711 = vrcp.f32 %v905_v51  ;;  %v1659_v32 = vld [vmem:[%s2569_s11] ss:$0 sm:$0xff] }
 0x408   :  { %1479 = vmatmul.msk.bf16.vlgmr.msrb.gmra.mxu0 %vm617_vm6, %v684_v50  ;;  %1713 = vrcp.f32 %v662_v53  ;;  %790 = vmatpush.bf16.msra.mxu1 %v1619_v62 }
 0x409   :  { %1030 = vmatpush.bf16.msra.mxu0 %v1627_v0 }
 0x40c   :  { %v665_v8 = vpop.xlane.xlu1 %664  ;;  %791 = vmatpush.bf16.msra.mxu1 %v1618_v5  ;;  %v1743_v5 = vld [vmem:[%s2587_s0 + $0x10] sm:$0xff] }
 0x40d   :  { %v1712_v38 = vpop.eup %1711  ;;  %1715 = vrcp.f32 %v665_v8  ;;  %1031 = vmatpush.bf16.msra.mxu0 %v1626_v6 }
 0x40e   :  { %v921_v56 = vmul.f32 %v1712_v38, %v2320_v7  ;;  %v1714_v60 = vpop.eup %1713  ;;  %v908_v61 = vpop.xlane.xlu2 %907 }
 0x40f   :  { %v680_v49 = vmul.f32 %v1714_v60, %v2315_v3  ;;  %1717 = vrcp.f32 %v908_v61 }
 0x410   :  { %v925_v59 = vpack.c.bf16 %v921_v56, %v920_v42  ;;  %792 = vmatpush.bf16.msra.mxu1 %v1617_v23 }
 0x412   :  { %1515 = vmatmul.msk.bf16.gmra.mxu3 %vm617_vm6, %v925_v59  ;;  %v1742_v59 = vld [vmem:[%s2587_s0 + $0x8] sm:$0xff] }
 0x413   :  { %v1716_v63 = vpop.eup %1715 }
 0x414   :  { %v681_v1 = vmul.f32 %v1716_v63, %v2325_v15  ;;  %v668_v7 = vpop.xlane.xlu1 %667  ;;  %793 = vmatpush.bf16.msra.mxu1 %v1616_v24 }
 0x415   :  { %v1718_v3 = vpop.eup %1717 }
 0x416   :  { %v911_v2 = vpop.xlane.xlu0 %910  ;;  %v685_v4 = vpack.c.bf16 %v681_v1, %v680_v49  ;;  %v922_v12 = vmul.f32 %v1718_v3, %v2330_v21  ;;  %v1625_v21 = vld [vmem:[%s2568_s10 + $0x50] sm:$0xff] }
 0x417   :  { %1719 = vrcp.f32 %v911_v2  ;;  %1032 = vmatpush.bf16.msra.mxu0 %v1625_v21 }
 0x418   :  { %1480 = vmatmul.msk.bf16.gmra.mxu0 %vm617_vm6, %v685_v4  ;;  %1721 = vrcp.f32 %v668_v7 }
 0x41b   :  { %1033 = vmatpush.bf16.msra.mxu0 %v1624_v25 }
 0x41c   :  { %v671_v10 = vpop.xlane.xlu2 %670 }
 0x41d   :  { %v1720_v11 = vpop.eup %1719  ;;  %1723 = vrcp.f32 %v671_v10 }
 0x41e   :  { %v923_v13 = vmul.f32 %v1720_v11, %v2339_v28  ;;  %v1722_v15 = vpop.eup %1721 }
 0x41f   :  { %v682_v18 = vmul.f32 %v1722_v15, %v2335_v26  ;;  %v1615_v26 = vld [vmem:[%s2568_s10] sm:$0xff]  ;;  %1034 = vmatpush.bf16.msra.mxu0 %v1623_v27  ;;  %s1053_s10 = sld [smem:[#allocation11]] }
 0x420   :  { %v926_v14 = vpack.c.bf16 %v923_v13, %v922_v12  ;;  %794 = vmatpush.bf16.msra.mxu1 %v1615_v26 }
 0x422   :  { %1516 = vmatmul.msk.bf16.gmra.mxu3 %vm617_vm6, %v926_v14  ;;  %v1744_v14 = vld [vmem:[%s2587_s0 + $0x18] sm:$0xff] }
 0x423   :  { %v1724_v17 = vpop.eup %1723 }
 0x424   :  { %v683_v20 = vmul.f32 %v1724_v17, %v2343_v30 }
 0x425   :  { %v1055_v47 = vstv %s1053_s10 }
 0x426   :  { %v686_v22 = vpack.c.bf16 %v683_v20, %v682_v18 }
 0x428   :  { %1481 = vmatmul.msk.bf16.gmra.mxu0 %vm617_vm6, %v686_v22 }
 0x485   :  { %v705_v46 = vpop.f32.mrf.mxu0  ;;  %v945_v28 = vpop.f32.mrf.mxu3 }
 0x48d   :  { %v707_v29 = vpop.f32.mrf.mxu0  ;;  %v947_v30 = vpop.f32.mrf.mxu3 }
 0x48e   :  { %v720_v31 = vpack.c.bf16 %v707_v29, %v705_v46  ;;  %v960_v33 = vpack.c.bf16 %v947_v30, %v945_v28 }
 0x490   :  { %795 = vmatmul.bf16.vlgmr.msra.gmra.mxu1 %v720_v31  ;;  %1035 = vmatmul.bf16.vlgmr.msra.gmra.mxu0 %v960_v33 }
 0x495   :  { %v710_v34 = vpop.f32.mrf.mxu0  ;;  %v950_v35 = vpop.f32.mrf.mxu3 }
 0x49d   :  { %v712_v9 = vpop.f32.mrf.mxu0  ;;  %v952_v36 = vpop.f32.mrf.mxu3 }
 0x49e   :  { %v721_v39 = vpack.c.bf16 %v712_v9, %v710_v34  ;;  %v961_v40 = vpack.c.bf16 %v952_v36, %v950_v35 }
 0x4a0   :  { %800 = vmatmul.bf16.gmra.mxu1 %v721_v39  ;;  %1040 = vmatmul.bf16.gmra.mxu0 %v961_v40 }
 0x4a5   :  { %v715_v41 = vpop.f32.mrf.mxu0  ;;  %v955_v43 = vpop.f32.mrf.mxu3 }
 0x4ad   :  { %v717_v44 = vpop.f32.mrf.mxu0  ;;  %v957_v45 = vpop.f32.mrf.mxu3 }
 0x4ae   :  { %v722_v48 = vpack.c.bf16 %v717_v44, %v715_v41  ;;  %v962_v19 = vpack.c.bf16 %v957_v45, %v955_v43  ;;  %v1633_v43 = vld [vmem:[%s2572_s14 + $0x14] sm:$0xf]  ;;  %v1562_v44 = vld [vmem:[%s2572_s14 + $0x18] sm:$0xf0]  ;;  %v1560_v45 = vld [vmem:[%s2572_s14 + $0x10] sm:$0xf] }
 0x4b0   :  { %804 = vmatmul.bf16.gmra.mxu1 %v722_v48  ;;  %1044 = vmatmul.bf16.gmra.mxu0 %v962_v19  ;;  %v1565_v48 = vor.u32 %v1633_v43, %v1562_v44  ;;  %v1634_v19 = vld [vmem:[%s2572_s14 + $0x14] sm:$0xf0] }
 0x4b2   :  { %1231 = vmatpush.bf16.msrb.mxu2 %v1565_v48 }
 0x50d   :  { %v796_v50 = vpop.f32.mrf.mxu1  ;;  %v1036_v51 = vpop.f32.mrf.mxu0 }
 0x50e   :  { %v809_v53 = vadd.f32 %v1659_v32, %v796_v50 }
 0x510   :  { %v1049_v54 = vadd.f32 %v1036_v51, %v809_v53  ;;  %v1552_v53 = vld [vmem:[%s2572_s14] sm:$0xf] }
 0x512   :  { %v1056_v52 = vmul.f32 %v1055_v47, %v1049_v54  ;;  %v1631_v54 = vld [vmem:[%s2572_s14 + $0x4] sm:$0xf] }
 0x514   :  { %v2419_v37 = vadd.f32 %v1741_v55, %v1056_v52  ;;  %v1554_v55 = vld [vmem:[%s2572_s14 + $0x8] sm:$0xf0] }
 0x515   :  { %v798_v8 = vpop.f32.mrf.mxu1  ;;  %v1038_v38 = vpop.f32.mrf.mxu0 }
 0x516   :  { %v810_v42 = vadd.f32 %v1659_v32, %v798_v8  ;;  %v1066_v56 = vsel %vm175_vm0, %v2419_v37, 0.0 }
 0x517   :  { %1067 = vadd.xlane.f32.xlu0 %v1066_v56 }
 0x518   :  { %v1050_v57 = vadd.f32 %v1038_v38, %v810_v42  ;;  %v1557_v38 = vor.u32 %v1631_v54, %v1554_v55  ;;  %v1642_v54 = vld [vmem:[%s2574_s16 + $0x38] sm:$0xff] }
 0x519   :  { %1354 = vmatpush.bf16.msrb.mxu3 %v1642_v54  ;;  %v1638_v55 = vld [vmem:[%s2574_s16 + $0x18] sm:$0xff] }
 0x51a   :  { %v1057_v58 = vmul.f32 %v1055_v47, %v1050_v57  ;;  %1232 = vmatpush.bf16.msrb.mxu2 %v1557_v38  ;;  %v1636_v38 = vld [vmem:[%s2574_s16 + $0x8] sm:$0xff] }
 0x51c   :  { %v2426_v60 = vadd.f32 %v1742_v59, %v1057_v58 }
 0x51d   :  { %v801_v61 = vpop.f32.mrf.mxu1  ;;  %v1041_v62 = vpop.f32.mrf.mxu0 }
 0x51e   :  { %v1069_v63 = vsel %vm175_vm0, %v2426_v60, 0.0 }
 0x51f   :  { %1070 = vadd.xlane.f32.xlu1 %v1069_v63 }
 0x525   :  { %v802_v0 = vpop.f32.mrf.mxu1  ;;  %v1042_v49 = vpop.f32.mrf.mxu0 }
 0x526   :  { %v811_v1 = vadd.f32 %v1659_v32, %v802_v0 }
 0x528   :  { %v1051_v2 = vadd.f32 %v1042_v49, %v811_v1 }
 0x52a   :  { %v1058_v4 = vmul.f32 %v1055_v47, %v1051_v2 }
 0x52c   :  { %v2433_v6 = vadd.f32 %v1743_v5, %v1058_v4 }
 0x52d   :  { %v805_v7 = vpop.f32.mrf.mxu1  ;;  %v1045_v3 = vpop.f32.mrf.mxu0 }
 0x52e   :  { %v812_v10 = vadd.f32 %v1659_v32, %v805_v7  ;;  %v1072_v11 = vsel %vm175_vm0, %v2433_v6, 0.0  ;;  %v1561_v32 = vor.u32 %v1634_v19, %v1560_v45 }
 0x52f   :  { %1073 = vadd.xlane.f32.xlu2 %v1072_v11  ;;  %v1660_v11 = vld [vmem:[%s2570_s12] ss:$0 sm:$0xff] }
 0x530   :  { %v1052_v12 = vadd.f32 %v1045_v3, %v812_v10  ;;  %1212 = vmatpush.bf16.msrb.mxu1 %v1561_v32 }
 0x532   :  { %v1059_v13 = vmul.f32 %v1055_v47, %v1052_v12  ;;  %v1632_v47 = vld [vmem:[%s2572_s14 + $0x4] sm:$0xf0]  ;;  %s2589_s14 = sld [smem:[#allocation22_spill]] }
 0x533   :  { %v1553_v52 = vor.u32 %v1632_v47, %v1552_v53 }
 0x534   :  { %v2440_v15 = vadd.f32 %v1744_v14, %v1059_v13 }
 0x535   :  { %v807_v17 = vpop.f32.mrf.mxu1  ;;  %v1047_v18 = vpop.f32.mrf.mxu0  ;;  %1213 = vmatpush.bf16.msrb.mxu1 %v1553_v52  ;;  %v1639_v52 = vld [vmem:[%s2574_s16 + $0x20] sm:$0xff] }
 0x536   :  { %v1075_v20 = vsel %vm175_vm0, %v2440_v15, 0.0  ;;  %v1661_v18 = vld [vmem:[%s2571_s13] ss:$0 sm:$0xff] }
 0x537   :  { %1076 = vadd.xlane.f32.xlu0 %v1075_v20 }
 0x538   :  { %s1392_s3 = sshll.u32 %s2589_s14, 4  ;;  %s1393_s3 = int_to_ptr.hbm [resolvable:$true] %s1392_s3 }
 0x58a   :  { %v1068_v22 = vpop.xlane.xlu0 %1067 }
 0x58b   :  { %v1078_v23 = vmul.f32 %v1068_v22, %v2028_v16 }
 0x58d   :  { %v2446_v21 = vsub.f32 %v2419_v37, %v1078_v23 }
 0x58f   :  { %v1086_v24 = vmul.f32 %v2446_v21, %v2446_v21 }
 0x591   :  { %v1090_v25 = vsel %vm175_vm0, %v1086_v24, 0.0 }
 0x592   :  { %1091 = vadd.xlane.f32.xlu1 %v1090_v25  ;;  %v1071_v26 = vpop.xlane.xlu1 %1070 }
 0x593   :  { %v1079_v27 = vmul.f32 %v1071_v26, %v2028_v16 }
 0x595   :  { %v2453_v46 = vsub.f32 %v2426_v60, %v1079_v27 }
 0x597   :  { %v1087_v28 = vmul.f32 %v2453_v46, %v2453_v46 }
 0x599   :  { %v1093_v29 = vsel %vm175_vm0, %v1087_v28, 0.0 }
 0x59a   :  { %1094 = vadd.xlane.f32.xlu2 %v1093_v29 }
 0x5a2   :  { %v1074_v30 = vpop.xlane.xlu2 %1073 }
 0x5a3   :  { %v1080_v31 = vmul.f32 %v1074_v30, %v2028_v16 }
 0x5a5   :  { %v2460_v33 = vsub.f32 %v2433_v6, %v1080_v31 }
 0x5a7   :  { %v1088_v34 = vmul.f32 %v2460_v33, %v2460_v33 }
 0x5a9   :  { %v1096_v35 = vsel %vm175_vm0, %v1088_v34, 0.0 }
 0x5aa   :  { %1097 = vadd.xlane.f32.xlu0 %v1096_v35  ;;  %v1077_v9 = vpop.xlane.xlu0 %1076 }
 0x5ab   :  { %v1081_v36 = vmul.f32 %v1077_v9, %v2028_v16 }
 0x5ad   :  { %v2467_v39 = vsub.f32 %v2440_v15, %v1081_v36 }
 0x5af   :  { %v1089_v40 = vmul.f32 %v2467_v39, %v2467_v39 }
 0x5b1   :  { %v1099_v41 = vsel %vm175_vm0, %v1089_v40, 0.0 }
 0x5b2   :  { %1100 = vadd.xlane.f32.xlu1 %v1099_v41 }
 0x605   :  { %v1092_v50 = vpop.xlane.xlu1 %1091 }
 0x606   :  { %v1102_v51 = vmul.f32 %v1092_v50, %v2028_v16 }
 0x608   :  { %v1106_v8 = vadd.f32 1e-05, %v1102_v51 }
 0x60a   :  { %1725 = vrsqrt.f32 %v1106_v8  ;;  %vm1116_vm8 = vweird.f32 %v1106_v8 }
 0x60d   :  { %v1095_v42 = vpop.xlane.xlu2 %1094 }
 0x60e   :  { %v1103_v56 = vmul.f32 %v1095_v42, %v2028_v16  ;;  %v1174_v42 = vld [vmem:[%s2573_s15] sm:$0x3]  ;;  %s1549_s15 = sld [smem:[#allocation11 + $0x1]] }
 0x610   :  { %v1726_v57 = vpop.eup %1725  ;;  %v1107_v58 = vadd.f32 1e-05, %v1103_v56  ;;  %v1177_v56 = vperm.slane %v1174_v42, 1 }
 0x611   :  { %v1111_v59 = vmul.f32 %v1726_v57, %v1106_v8  ;;  %vm1117_vm7 = vweird.f32 %v1726_v57  ;;  %v1637_v8 = vld [vmem:[%s2574_s16 + $0x10] sm:$0xff] }
 0x612   :  { %1727 = vrsqrt.f32 %v1107_v58  ;;  %vm1118_vm9 = vmor %vm1116_vm8, %vm1117_vm7  ;;  %vm1126_vm11 = vweird.f32 %v1107_v58 }
 0x613   :  { %v1112_v61 = vmul.f32 %v1726_v57, %v1111_v59 }
 0x615   :  { %v1113_v62 = vmul.f32 0.5, %v1112_v61 }
 0x617   :  { %v1114_v63 = vsub.f32 1.5, %v1113_v62 }
 0x618   :  { %v1728_v0 = vpop.eup %1727 }
 0x619   :  { %v1115_v49 = vmul.f32 %v1726_v57, %v1114_v63  ;;  %v1121_v1 = vmul.f32 %v1728_v0, %v1107_v58  ;;  %vm1127_vm10 = vweird.f32 %v1728_v0 }
 0x61a   :  { %vm1128_vm12 = vmor %vm1126_vm11, %vm1127_vm10 }
 0x61b   :  { %v1122_v2 = vmul.f32 %v1728_v0, %v1121_v1  ;;  %v1119_v4 = vsel %vm1118_vm9, %v1726_v57, %v1115_v49  ;;  %v1635_v57 = vld [vmem:[%s2574_s16] sm:$0xff] }
 0x61c   :  { %v1150_v12 = vmul.f32 %v1119_v4, %v2446_v21 }
 0x61d   :  { %v1123_v5 = vmul.f32 0.5, %v1122_v2  ;;  %v1098_v7 = vpop.xlane.xlu0 %1097 }
 0x61e   :  { %v1104_v3 = vmul.f32 %v1098_v7, %v2028_v16  ;;  %v1157_v20 = vmul.f32 %v1660_v11, %v1150_v12 }
 0x61f   :  { %v1124_v10 = vsub.f32 1.5, %v1123_v5 }
 0x620   :  { %v1108_v13 = vadd.f32 1e-05, %v1104_v3  ;;  %v1164_v27 = vadd.f32 %v1661_v18, %v1157_v20 }
 0x621   :  { %v1125_v14 = vmul.f32 %v1728_v0, %v1124_v10 }
 0x622   :  { %1729 = vrsqrt.f32 %v1108_v13  ;;  %vm1136_vm14 = vweird.f32 %v1108_v13 }
 0x623   :  { %v1129_v17 = vsel %vm1128_vm12, %v1728_v0, %v1125_v14 }
 0x624   :  { %v1151_v22 = vmul.f32 %v1129_v17, %v2453_v46 }
 0x625   :  { %v1101_v23 = vpop.xlane.xlu1 %1100 }
 0x626   :  { %v1158_v24 = vmul.f32 %v1660_v11, %v1151_v22  ;;  %v1105_v25 = vmul.f32 %v1101_v23, %v2028_v16 }
 0x628   :  { %v1730_v26 = vpop.eup %1729  ;;  %v1165_v21 = vadd.f32 %v1661_v18, %v1158_v24  ;;  %v1109_v28 = vadd.f32 1e-05, %v1105_v25 }
 0x629   :  { %v1131_v29 = vmul.f32 %v1730_v26, %v1108_v13  ;;  %vm1137_vm13 = vweird.f32 %v1730_v26 }
 0x62a   :  { %1731 = vrsqrt.f32 %v1109_v28  ;;  %v1168_v30 = vpack.c.bf16 %v1165_v21, %v1164_v27  ;;  %vm1138_vm15 = vmor %vm1136_vm14, %vm1137_vm13  ;;  %vm1146_vm2 = vweird.f32 %v1109_v28 }
 0x62b   :  { %v1132_v31 = vmul.f32 %v1730_v26, %v1131_v29 }
 0x62c   :  { %1566 = vmatmul.msk.bf16.vlgmr.msrb.gmra.mxu1 %vm175_vm0, %v1168_v30  ;;  %1568 = vmatmul.msk.bf16.vlgmr.msrb.gmra.mxu2 %vm175_vm0, %v1168_v30 }
 0x62d   :  { %v1133_v34 = vmul.f32 0.5, %v1132_v31 }
 0x62f   :  { %v1134_v35 = vsub.f32 1.5, %v1133_v34 }
 0x630   :  { %v1732_v9 = vpop.eup %1731 }
 0x631   :  { %v1135_v46 = vmul.f32 %v1730_v26, %v1134_v35  ;;  %v1141_v36 = vmul.f32 %v1732_v9, %v1109_v28  ;;  %vm1147_vm1 = vweird.f32 %v1732_v9 }
 0x632   :  { %vm1148_vm3 = vmor %vm1146_vm2, %vm1147_vm1 }
 0x633   :  { %v1142_v16 = vmul.f32 %v1732_v9, %v1141_v36  ;;  %v1139_v40 = vsel %vm1138_vm15, %v1730_v26, %v1135_v46 }
 0x634   :  { %v1152_v44 = vmul.f32 %v1139_v40, %v2460_v33  ;;  %v1641_v33 = vld [vmem:[%s2574_s16 + $0x30] sm:$0xff] }
 0x635   :  { %v1143_v41 = vmul.f32 0.5, %v1142_v16  ;;  %1355 = vmatpush.bf16.msrb.mxu3 %v1641_v33 }
 0x636   :  { %v1159_v32 = vmul.f32 %v1660_v11, %v1152_v44 }
 0x637   :  { %v1144_v43 = vsub.f32 1.5, %v1143_v41 }
 0x638   :  { %v1166_v51 = vadd.f32 %v1661_v18, %v1159_v32 }
 0x639   :  { %v1145_v45 = vmul.f32 %v1732_v9, %v1144_v43 }
 0x63b   :  { %v1149_v48 = vsel %vm1148_vm3, %v1732_v9, %v1145_v45 }
 0x63c   :  { %v1153_v19 = vmul.f32 %v1149_v48, %v2467_v39  ;;  %v1640_v39 = vld [vmem:[%s2574_s16 + $0x28] sm:$0xff] }
 0x63d   :  { %1356 = vmatpush.bf16.msrb.mxu3 %v1640_v39 }
 0x63e   :  { %v1160_v50 = vmul.f32 %v1660_v11, %v1153_v19 }
 0x640   :  { %v1167_v53 = vadd.f32 %v1661_v18, %v1160_v50  ;;  %v1176_v18 = vperm.slane %v1174_v42, 0 }
 0x641   :  { %1357 = vmatpush.bf16.msrb.mxu3 %v1639_v52 }
 0x642   :  { %v1169_v47 = vpack.c.bf16 %v1167_v53, %v1166_v51 }
 0x644   :  { %1567 = vmatmul.msk.bf16.gmra.mxu1 %vm175_vm0, %v1169_v47  ;;  %1569 = vmatmul.msk.bf16.gmra.mxu2 %vm175_vm0, %v1169_v47 }
 0x645   :  { %1358 = vmatpush.bf16.msrb.mxu3 %v1638_v55 }
 0x649   :  { %1359 = vmatpush.bf16.msrb.mxu3 %v1637_v8 }
 0x64d   :  { %1360 = vmatpush.bf16.msrb.mxu3 %v1636_v38 }
 0x651   :  { %1361 = vmatpush.bf16.msrb.mxu3 %v1635_v57  ;;  %v1662_v57 = vld [vmem:[%s2575_s17] ss:$0 sm:$0xff]  ;;  %s1897_s17 = smov [#allocation12]  }
 0x652   :  { %s1390_s21 = sshll.u32 %s1897_s17, 4  ;;  %s1391_s21 = int_to_ptr.vmem [resolvable:$true] %s1390_s21 }
 0x6a9   :  { %v1215_v3 = vpop.f32.mrf.mxu1 }
 0x6aa   :  { %v1216_v28 = vadd.f32 %v1215_v3, %v1176_v18 }
 0x6af   :  { %v1234_v58 = vpop.f32.mrf.mxu2 }
 0x6b0   :  { %v1235_v59 = vadd.f32 %v1234_v58, %v1177_v56 }
 0x6b1   :  { %v1217_v23 = vpop.f32.mrf.mxu1 }
 0x6b2   :  { %v1248_v61 = vmul.f32 %v1235_v59, %v1235_v59  ;;  %v1244_v20 = vmul.f32 0.5, %v1235_v59  ;;  %v1218_v29 = vadd.f32 %v1217_v23, %v1176_v18 }
 0x6b4   :  { %v1252_v62 = vmul.f32 %v1248_v61, %v1235_v59 }
 0x6b6   :  { %v1256_v63 = vmul.f32 0.044715, %v1252_v62 }
 0x6b7   :  { %v1236_v0 = vpop.f32.mrf.mxu2 }
 0x6b8   :  { %v1260_v49 = vadd.f32 %v1256_v63, %v1235_v59  ;;  %v1237_v1 = vadd.f32 %v1236_v0, %v1177_v56  ;;  %v1373_v59 = vstv %s1549_s15 }
 0x6ba   :  { %v1264_v2 = vmul.f32 0.7978846, %v1260_v49  ;;  %v1249_v4 = vmul.f32 %v1237_v1, %v1237_v1  ;;  %v1245_v26 = vmul.f32 0.5, %v1237_v1 }
 0x6bc   :  { %v1253_v5 = vmul.f32 %v1249_v4, %v1237_v1  ;;  %1733 = vtanh.f32 %v1264_v2 }
 0x6be   :  { %v1257_v7 = vmul.f32 0.044715, %v1253_v5 }
 0x6c0   :  { %v1261_v10 = vadd.f32 %v1257_v7, %v1237_v1 }
 0x6c1   :  { %v1220_v45 = vpop.f32.mrf.mxu1 }
 0x6c2   :  { %v1265_v11 = vmul.f32 0.7978846, %v1261_v10  ;;  %v1734_v12 = vpop.eup %1733  ;;  %v1221_v52 = vadd.f32 %v1220_v45, %v1176_v18 }
 0x6c3   :  { %v1272_v13 = vadd.f32 1.0, %v1734_v12 }
 0x6c4   :  { %1735 = vtanh.f32 %v1265_v11 }
 0x6c5   :  { %v1276_v25 = vmul.f32 %v1272_v13, %v1244_v20 }
 0x6c7   :  { %v1239_v14 = vpop.f32.mrf.mxu2  ;;  %v1280_v35 = vmul.f32 %v1276_v25, %v1216_v28 }
 0x6c8   :  { %v1240_v17 = vadd.f32 %v1239_v14, %v1177_v56 }
 0x6c9   :  { %v1222_v47 = vpop.f32.mrf.mxu1 }
 0x6ca   :  { %v1736_v22 = vpop.eup %1735  ;;  %v1250_v24 = vmul.f32 %v1240_v17, %v1240_v17  ;;  %v1246_v51 = vmul.f32 0.5, %v1240_v17  ;;  %v1223_v55 = vadd.f32 %v1222_v47, %v1176_v18 }
 0x6cb   :  { %v1273_v27 = vadd.f32 1.0, %v1736_v22 }
 0x6cc   :  { %v1254_v21 = vmul.f32 %v1250_v24, %v1240_v17 }
 0x6cd   :  { %v1277_v30 = vmul.f32 %v1273_v27, %v1245_v26 }
 0x6ce   :  { %v1258_v31 = vmul.f32 0.044715, %v1254_v21 }
 0x6cf   :  { %v1241_v34 = vpop.f32.mrf.mxu2  ;;  %v1281_v9 = vmul.f32 %v1277_v30, %v1218_v29 }
 0x6d0   :  { %v1262_v46 = vadd.f32 %v1258_v31, %v1240_v17  ;;  %v1242_v36 = vadd.f32 %v1241_v34, %v1177_v56 }
 0x6d1   :  { %v1284_v16 = vpack.c.bf16 %v1281_v9, %v1280_v35 }
 0x6d2   :  { %v1266_v40 = vmul.f32 0.7978846, %v1262_v46  ;;  %v1251_v41 = vmul.f32 %v1242_v36, %v1242_v36  ;;  %v1247_v54 = vmul.f32 0.5, %v1242_v36 }
 0x6d3   :  { %1362 = vmatmul.bf16.vlgmr.msrb.gmra.mxu3 %v1284_v16 }
 0x6d4   :  { %v1255_v43 = vmul.f32 %v1251_v41, %v1242_v36  ;;  %1737 = vtanh.f32 %v1266_v40 }
 0x6d6   :  { %v1259_v44 = vmul.f32 0.044715, %v1255_v43 }
 0x6d8   :  { %v1263_v48 = vadd.f32 %v1259_v44, %v1242_v36 }
 0x6da   :  { %v1267_v19 = vmul.f32 0.7978846, %v1263_v48  ;;  %v1738_v32 = vpop.eup %1737 }
 0x6db   :  { %v1274_v50 = vadd.f32 1.0, %v1738_v32 }
 0x6dc   :  { %1739 = vtanh.f32 %v1267_v19 }
 0x6dd   :  { %v1278_v39 = vmul.f32 %v1274_v50, %v1246_v51 }
 0x6df   :  { %v1282_v38 = vmul.f32 %v1278_v39, %v1221_v52 }
 0x6e2   :  { %v1740_v53 = vpop.eup %1739 }
 0x6e3   :  { %v1275_v33 = vadd.f32 1.0, %v1740_v53 }
 0x6e5   :  { %v1279_v8 = vmul.f32 %v1275_v33, %v1247_v54 }
 0x6e7   :  { %v1283_v42 = vmul.f32 %v1279_v8, %v1223_v55 }
 0x6e9   :  { %v1285_v56 = vpack.c.bf16 %v1283_v42, %v1282_v38 }
 0x6eb   :  { %1367 = vmatmul.bf16.gmra.mxu3 %v1285_v56 }
 0x756   :  { %v1363_v58 = vpop.f32.mrf.mxu3 }
 0x757   :  { %v1364_v61 = vadd.f32 %v1662_v57, %v1363_v58 }
 0x759   :  { %v1374_v62 = vmul.f32 %v1373_v59, %v1364_v61 }
 0x75b   :  { %v1378_v63 = vadd.f32 %v1374_v62, %v2419_v37 }
 0x75d   :  { %1382 = vst.msk [vmem:[#allocation12] sm:$0xff] %vm175_vm0, %v1378_v63 }
 0x75e   :  { %v1365_v0 = vpop.f32.mrf.mxu3 }
 0x75f   :  { %v1366_v49 = vadd.f32 %v1662_v57, %v1365_v0 }
 0x761   :  { %v1375_v1 = vmul.f32 %v1373_v59, %v1366_v49 }
 0x763   :  { %v1379_v2 = vadd.f32 %v1375_v1, %v2426_v60 }
 0x765   :  { %1383 = vst.msk [vmem:[#allocation12 + $0x8] sm:$0xff] %vm175_vm0, %v1379_v2 }
 0x76e   :  { %v1368_v4 = vpop.f32.mrf.mxu3 }
 0x76f   :  { %v1369_v5 = vadd.f32 %v1662_v57, %v1368_v4 }
 0x771   :  { %v1376_v7 = vmul.f32 %v1373_v59, %v1369_v5 }
 0x773   :  { %v1380_v3 = vadd.f32 %v1376_v7, %v2433_v6 }
 0x775   :  { %1384 = vst.msk [vmem:[#allocation12 + $0x10] sm:$0xff] %vm175_vm0, %v1380_v3 }
 0x776   :  { %v1370_v10 = vpop.f32.mrf.mxu3 }
 0x777   :  { %v1371_v11 = vadd.f32 %v1662_v57, %v1370_v10 }
 0x779   :  { %v1377_v37 = vmul.f32 %v1373_v59, %v1371_v11 }
 0x77b   :  { %v1381_v60 = vadd.f32 %v1377_v37, %v2440_v15 }
 0x77d   :  { %1385 = vst.msk [vmem:[#allocation12 + $0x18] sm:$0xff] %vm175_vm0, %v1381_v60 }
 0x77e   :  { %1398 = dma.vmem_to_hbm [thread:$0]  %s1391_s21, 512, %s1393_s3, [#allocation4], %s1891_s29, %s1891_s29, %s1892_s19  }
 0x77f   :  { %1885 = dma.done.wait [#allocation4], 512  }
 0x780   :  { %1886 = vsyncadd [#allocation4], 4294966784 }
 0x781   :  { %1403 = vsyncpa [#allocation3], 1 }
 0x782   :  { %1404 = vsyncpa [#allocation7], 1 }
 0x783   :  { %1405 = vsyncpa [#allocation10], 1 }
 0x784   :  { %1406 = vsyncpa [#allocation4], 1 }
 0x785   :  { %1407 = vsyncpa [#allocation5], 1 }

</bundles_post_ra>
